<compile_context>
chip_gen: v6e
topology: v6e:2x2x1
jax: 0.10.0
libtpu: 0.0.40
codegen_flags: <defaults>
</compile_context>

<pallas_src>
import numpy as np
import jax
import jax.numpy as jnp
from jax import lax
from jax.experimental import pallas as pl
from jax.experimental.pallas import tpu as pltpu


def _round_up(x, m):
    return ((x + m - 1) // m) * m


def _pick_tile(dim, candidates):
    for c in candidates:
        if c <= dim and dim % c == 0:
            return c
    return dim


def _vmem_limit_bytes():
    """Derive a scoped-VMEM limit from the actual chip (v7x only has 64 MiB)."""
    cap = 64 * 1024 * 1024
    try:
        cap = int(pltpu.get_tpu_info().vmem_capacity_bytes)
    except Exception:
        pass
    return max(16 * 1024 * 1024, min((cap * 3) // 4, 100 * 1024 * 1024))


# --------------------------------------------------------------------------
# Tiled GEMM + bias (FC head).  Grid (M tiles, N tiles, K tiles); K is an
# "arbitrary" axis with an f32 VMEM accumulator so large K never blows VMEM.
# a/b are bf16 (MXU-native), accumulation f32, bias added on the last K step.
# --------------------------------------------------------------------------
def _matmul_bias_kernel(a_ref, b_ref, bias_ref, o_ref, acc_ref):
    @pl.when(pl.program_id(2) == 0)
    def _():
        acc_ref[...] = jnp.zeros_like(acc_ref)

    acc_ref[...] += jnp.dot(a_ref[...], b_ref[...],
                            preferred_element_type=jnp.float32)

    @pl.when(pl.program_id(2) == pl.num_programs(2) - 1)
    def _():
        o_ref[...] = (acc_ref[...] + bias_ref[...]).astype(o_ref.dtype)


def _matmul_bias(a, b, bias, vmem_limit):
    """(M, K) bf16 @ (K, N) bf16 + bias(1, N) f32 -> (M, N) f32.

    Caller guarantees M is a multiple of 16 and K, N multiples of 128.
    """
    M, K = a.shape
    _, N = b.shape
    tm = _pick_tile(M, (512, 256, 128, 64, 32, 16, 8))
    tn = _pick_tile(N, (1024, 512, 256, 128))
    tk = K
    for cand in (2048, 1024, 512, 256, 128):
        # double-buffered (tm,tk)+(tk,tn) bf16 blocks must fit comfortably
        if cand <= K and K % cand == 0 and 2 * (tm + tn) * cand * 2 <= vmem_limit // 2:
            tk = cand
            break
    return pl.pallas_call(
        _matmul_bias_kernel,
        out_shape=jax.ShapeDtypeStruct((M, N), jnp.float32),
        grid_spec=pltpu.PrefetchScalarGridSpec(
            num_scalar_prefetch=0,
            grid=(M // tm, N // tn, K // tk),
            in_specs=[
                pl.BlockSpec((tm, tk), lambda i, j, k: (i, k)),
                pl.BlockSpec((tk, tn), lambda i, j, k: (k, j)),
                pl.BlockSpec((1, tn), lambda i, j, k: (0, j)),
            ],
            out_specs=pl.BlockSpec((tm, tn), lambda i, j, k: (i, j)),
            scratch_shapes=[pltpu.VMEM((tm, tn), jnp.float32)],
        ),
        compiler_params=pltpu.CompilerParams(
            dimension_semantics=("parallel", "parallel", "arbitrary"),
            vmem_limit_bytes=vmem_limit),
    )(a, b, bias)


# --------------------------------------------------------------------------
# Fused input-projection + LSTM recurrence.  One grid step = one (batch tile,
# time chunk).  Time-major layout so per-step accesses are full (TB, .) slabs.
#
#   emb_ref  : (Tc, TB, Ep)   bf16  embedded inputs for this chunk
#   wih_ref  : (Ep, 4Hp)      bf16  W_ih^T, gate order (i, f, o, g)
#   whh_ref  : (Hp, 4Hp)      bf16  W_hh^T, gate order (i, f, o, g)
#   bias_ref : (1, 4Hp)       f32   b_ih + b_hh, gate order (i, f, o, g)
#   h_out_ref: (Tc, TB, Hp)   bf16  hidden states emitted for this chunk
#   h_sc/c_sc: (TB, Hp)       f32   LSTM state, persists across time chunks
#   gx_sc    : (Tc, TB, 4Hp)  f32   chunk input-projection pre-activations
# --------------------------------------------------------------------------
def _lstm_recurrence_kernel(emb_ref, wih_ref, whh_ref, bias_ref,
                            h_out_ref, h_sc, c_sc, gx_sc):
    @pl.when(pl.program_id(1) == 0)           # new batch tile -> reset state
    def _():
        h_sc[...] = jnp.zeros_like(h_sc)
        c_sc[...] = jnp.zeros_like(c_sc)

    Tc, TB, Ep = emb_ref.shape
    Hp = h_sc.shape[-1]

    # Input projection for the whole chunk: one big MXU GEMM (bf16 in, f32 acc)
    # instead of a separate kernel writing gx through HBM.
    gx = jnp.dot(emb_ref[...].reshape(Tc * TB, Ep), wih_ref[...],
                 preferred_element_type=jnp.float32) + bias_ref[...]
    gx_sc[...] = gx.reshape(Tc, TB, 4 * Hp)

    whh = whh_ref[...]                        # (Hp, 4Hp) bf16, VMEM-resident

    def step(s, carry):
        h, c = carry                          # f32 (TB, Hp)
        gates = gx_sc[s] + jnp.dot(h.astype(whh.dtype), whh,
                                   preferred_element_type=jnp.float32)
        sig = jax.nn.sigmoid(gates[:, :3 * Hp])       # (i, f, o) in one slab
        i_g = sig[:, 0 * Hp:1 * Hp]
        f_g = sig[:, 1 * Hp:2 * Hp]
        o_g = sig[:, 2 * Hp:3 * Hp]
        g_g = jnp.tanh(gates[:, 3 * Hp:])             # g gate
        c = f_g * c + i_g * g_g
        h = o_g * jnp.tanh(c)
        h_out_ref[s] = h.astype(h_out_ref.dtype)      # full (TB, Hp) slab store
        return (h, c)

    h, c = lax.fori_loop(0, Tc, step, (h_sc[...], c_sc[...]), unroll=True)
    h_sc[...] = h
    c_sc[...] = c


# --------------------------------------------------------------------------
# Forward pass wrapper (matches nn.Embedding -> nn.LSTM(batch_first) -> Linear)
# --------------------------------------------------------------------------
def melody_generator_forward(x_tokens, params):
    """x_tokens: int32 (B, T). Returns float32 logits (B, T, V)."""
    emb_table = params["embedding"]          # (V, E)
    w_ih = params["w_ih"]                    # (4H, E)   PyTorch gate order i,f,g,o
    w_hh = params["w_hh"]                    # (4H, H)
    b_ih = params["b_ih"]                    # (4H,)
    b_hh = params["b_hh"]                    # (4H,)
    w_fc = params["w_fc"]                    # (V, H)
    b_fc = params["b_fc"]                    # (V,)

    B, T = x_tokens.shape
    V, E = emb_table.shape
    H = w_hh.shape[1]

    f32, bf16 = jnp.float32, jnp.bfloat16
    vmem_limit = _vmem_limit_bytes()

    # Pad to MXU/vreg-friendly geometry: batch to 16 (bf16 sublane tile) so all
    # second-minor block dims are tile-aligned, feature dims to 128 (lanes) so
    # per-gate slices land on lane-tile boundaries.  Zero padding is inert:
    # padded hidden units keep zero pre-activations so their h/c stay 0.
    Bp = _round_up(B, 16)
    Ep = _round_up(E, 128)
    Hp = _round_up(H, 128)
    Vp = _round_up(V, 128)

    # Batch tile: leading "parallel" grid axis (lets v7x split batch across TCs).
    TB = Bp // 2 if (Bp >= 32 and Bp % 32 == 0) else Bp

    # Time chunk: amortize the ~0.35us/grid-step overhead while keeping the
    # double-buffered chunk blocks + gx scratch + resident weights inside VMEM.
    # (W_ih^T / W_hh^T stay VMEM-resident via constant index maps; they are
    # still counted double-buffered here — a Buffered(1) spec could halve that.)
    def _chunk_bytes(tc):
        return (2 * tc * TB * Ep * 2              # embedded blocks (bf16, x2 buf)
                + 2 * tc * TB * Hp * 2            # h_out blocks (bf16, x2 buf)
                + tc * TB * 4 * Hp * 4            # gx scratch (f32)
                + 2 * (Ep + Hp) * 4 * Hp * 2      # W_ih^T + W_hh^T (bf16, x2 buf)
                + 2 * TB * Hp * 4)                # h/c state (f32)
    Tc = min(16, T)
    while Tc > 1 and _chunk_bytes(Tc) > (vmem_limit * 3) // 4:
        Tc = max(1, Tc // 2)
    Tp = _round_up(T, Tc)

    # ---- one-time parameter prep (tiny): pad, permute gates (i,f,g,o) ->
    # (i,f,o,g) so sigmoids form one contiguous slab, cast weights to bf16 ----
    perm = jnp.array([0, 1, 3, 2], dtype=jnp.int32)
    wih_p = jnp.pad(w_ih.astype(f32).reshape(4, H, E),
                    ((0, 0), (0, Hp - H), (0, Ep - E)))[perm].reshape(4 * Hp, Ep)
    whh_p = jnp.pad(w_hh.astype(f32).reshape(4, H, H),
                    ((0, 0), (0, Hp - H), (0, Hp - H)))[perm].reshape(4 * Hp, Hp)
    bias_p = jnp.pad((b_ih + b_hh).astype(f32).reshape(4, H),
                     ((0, 0), (0, Hp - H)))[perm].reshape(1, 4 * Hp)
    emb_p = jnp.pad(emb_table.astype(f32), ((0, 0), (0, Ep - E))).astype(bf16)
    wfc_p = jnp.pad(w_fc.astype(f32), ((0, Vp - V), (0, Hp - H))).astype(bf16)
    bfc_p = jnp.pad(b_fc.astype(f32), (0, Vp - V)).reshape(1, Vp)

    wih_t = wih_p.T.astype(bf16)             # (Ep, 4Hp)
    whh_t = whh_p.T.astype(bf16)             # (Hp, 4Hp)

    # ---- embedding lookup (gather) is XLA glue; built directly time-major ---
    embedded = jnp.take(emb_p, x_tokens.T, axis=0)            # (T, B, Ep) bf16
    embedded = jnp.pad(embedded, ((0, Tp - T), (0, Bp - B), (0, 0)))

    # ---- fused input-projection + sequential recurrence ---------------------
    h_seq = pl.pallas_call(
        _lstm_recurrence_kernel,
        out_shape=jax.ShapeDtypeStruct((Tp, Bp, Hp), bf16),
        grid_spec=pltpu.PrefetchScalarGridSpec(
            num_scalar_prefetch=0,
            grid=(Bp // TB, Tp // Tc),
            in_specs=[
                pl.BlockSpec((Tc, TB, Ep), lambda b, t: (t, b, 0)),
                # Constant index maps: weights stay VMEM-resident across steps.
                pl.BlockSpec((Ep, 4 * Hp), lambda b, t: (0, 0)),
                pl.BlockSpec((Hp, 4 * Hp), lambda b, t: (0, 0)),
                pl.BlockSpec((1, 4 * Hp), lambda b, t: (0, 0)),
            ],
            out_specs=pl.BlockSpec((Tc, TB, Hp), lambda b, t: (t, b, 0)),
            scratch_shapes=[
                pltpu.VMEM((TB, Hp), f32),           # h state (carried over time)
                pltpu.VMEM((TB, Hp), f32),           # c state (carried over time)
                pltpu.VMEM((Tc, TB, 4 * Hp), f32),   # chunk pre-activations
            ],
        ),
        compiler_params=pltpu.CompilerParams(
            # Batch rows are independent (usable by both v7x TensorCores);
            # the time axis must stay sequential for the h/c carry.
            dimension_semantics=("parallel", "arbitrary"),
            vmem_limit_bytes=vmem_limit),
    )(embedded, wih_t, whh_t, bias_p)

    # ---- FC head: one large fully-parallel GEMM over all Tp*Bp rows ---------
    logits = _matmul_bias(h_seq.reshape(Tp * Bp, Hp), wfc_p.T, bfc_p, vmem_limit)
    logits = logits.reshape(Tp, Bp, Vp)

    # Slice off padding; return batch-major (B, T, V) like the PyTorch module.
    return jnp.transpose(logits[:T, :B, :V], (1, 0, 2))


# --------------------------------------------------------------------------
# Pure-JAX f32 reference replicating torch semantics (gate order i, f, g, o).
# --------------------------------------------------------------------------
def _reference_forward(x_tokens, params):
    emb = jnp.take(params["embedding"], x_tokens, axis=0)       # (B, T, E)
    B, T, E = emb.shape
    H = params["w_hh"].shape[1]

    def step(carry, x_t):
        h, c = carry
        gates = (x_t @ params["w_ih"].T + params["b_ih"]
                 + h @ params["w_hh"].T + params["b_hh"])
        i = jax.nn.sigmoid(gates[:, 0 * H:1 * H])
        f = jax.nn.sigmoid(gates[:, 1 * H:2 * H])
        g = jnp.tanh(gates[:, 2 * H:3 * H])
        o = jax.nn.sigmoid(gates[:, 3 * H:4 * H])
        c = f * c + i * g
        h = o * jnp.tanh(c)
        return (h, c), h

    h0 = jnp.zeros((B, H), jnp.float32)
    c0 = jnp.zeros((B, H), jnp.float32)
    _, hs = jax.lax.scan(step, (h0, c0), jnp.transpose(emb, (1, 0, 2)))
    hs = jnp.transpose(hs, (1, 0, 2))                            # (B, T, H)
    return hs @ params["w_fc"].T + params["b_fc"]                # (B, T, V)


if __name__ == "__main__":
    # Small, TPU-friendly sizes consistent with the module's forward pass.
    vocab_size = 64
    embedding_dim = 16
    hidden_units = 32
    batch = 2
    seq_len = 8

    key = jax.random.PRNGKey(0)
    keys = jax.random.split(key, 8)

    params = {
        "embedding": jax.random.normal(keys[0], (vocab_size, embedding_dim),
                                       jnp.float32) * 0.1,
        "w_ih": jax.random.normal(keys[1], (4 * hidden_units, embedding_dim),
                                  jnp.float32) * 0.1,
        "w_hh": jax.random.normal(keys[2], (4 * hidden_units, hidden_units),
                                  jnp.float32) * 0.1,
        "b_ih": jax.random.normal(keys[3], (4 * hidden_units,), jnp.float32) * 0.1,
        "b_hh": jax.random.normal(keys[4], (4 * hidden_units,), jnp.float32) * 0.1,
        "w_fc": jax.random.normal(keys[5], (vocab_size, hidden_units),
                                  jnp.float32) * 0.1,
        "b_fc": jax.random.normal(keys[6], (vocab_size,), jnp.float32) * 0.1,
    }

    x = jax.random.randint(keys[7], (batch, seq_len), 0, vocab_size, jnp.int32)

    out = jax.block_until_ready(melody_generator_forward(x, params))
    assert out.shape == (batch, seq_len, vocab_size)
    assert bool(jnp.all(jnp.isfinite(out)))

    ref = jax.block_until_ready(_reference_forward(x, params))
    # bf16 MXU inputs (f32 accumulation) => relaxed tolerance vs f32 reference.
    np.testing.assert_allclose(np.asarray(out), np.asarray(ref),
                               rtol=5e-2, atol=2e-2)

    print("KERNEL_OK")
</pallas_src>

<mosaic_0001>
module attributes {stable_mosaic.version = 11 : i64} {
  func.func @_lstm_recurrence_kernel(%arg0: i32, %arg1: i32, %arg2: memref<8x16x128xbf16, #tpu.memory_space<vmem>>, %arg3: memref<128x512xbf16, #tpu.memory_space<vmem>>, %arg4: memref<128x512xbf16, #tpu.memory_space<vmem>>, %arg5: memref<1x512xf32, #tpu.memory_space<vmem>>, %arg6: memref<8x16x128xbf16, #tpu.memory_space<vmem>>, %arg7: memref<16x128xf32, #tpu.memory_space<vmem>>, %arg8: memref<16x128xf32, #tpu.memory_space<vmem>>, %arg9: memref<8x16x512xf32, #tpu.memory_space<vmem>>) attributes {dimension_semantics = [#tpu.dimension_semantics<parallel>, #tpu.dimension_semantics<arbitrary>], iteration_bounds = array<i64: 1, 1>, scalar_prefetch = 0 : i64, scratch_operands = 3 : i64, tpu.core_type = #tpu.core_type<tc>, window_params = [{transform_indices = @transform_0, window_bounds = array<i64: 8, 16, 128>}, {pipeline_mode = #tpu.pipeline_mode<synchronous>, transform_indices = @transform_1, window_bounds = array<i64: 128, 512>}, {pipeline_mode = #tpu.pipeline_mode<synchronous>, transform_indices = @transform_2, window_bounds = array<i64: 128, 512>}, {pipeline_mode = #tpu.pipeline_mode<synchronous>, transform_indices = @transform_3, window_bounds = array<i64: 1, 512>}, {transform_indices = @transform_4, window_bounds = array<i64: 8, 16, 128>}]} {
    %c0_i32 = arith.constant 0 : i32
    %0 = arith.cmpi eq, %arg1, %c0_i32 : i32
    %1 = arith.extui %0 : i1 to i32
    %c0_i32_0 = arith.constant 0 : i32
    %2 = arith.cmpi ne, %1, %c0_i32_0 : i32
    scf.if %2 {
      %cst_69 = arith.constant 0.000000e+00 : f32
      %233 = vector.broadcast %cst_69 : f32 to vector<16x128xf32>
      %c0_70 = arith.constant 0 : index
      %c0_71 = arith.constant 0 : index
      %234 = vector.load %arg7[%c0_70, %c0_71] : memref<16x128xf32, #tpu.memory_space<vmem>>, vector<16x128xf32>
      tpu.vector_store %arg7[%c0_70, %c0_71], %233 {strides = array<i32>} : memref<16x128xf32, #tpu.memory_space<vmem>>, vector<16x128xf32>,
      %cst_72 = arith.constant 0.000000e+00 : f32
      %235 = vector.broadcast %cst_72 : f32 to vector<16x128xf32>
      %c0_73 = arith.constant 0 : index
      %c0_74 = arith.constant 0 : index
      %236 = vector.load %arg8[%c0_73, %c0_74] : memref<16x128xf32, #tpu.memory_space<vmem>>, vector<16x128xf32>
      tpu.vector_store %arg8[%c0_73, %c0_74], %235 {strides = array<i32>} : memref<16x128xf32, #tpu.memory_space<vmem>>, vector<16x128xf32>,
    } else {
    }
    %c0 = arith.constant 0 : index
    %c0_1 = arith.constant 0 : index
    %c0_2 = arith.constant 0 : index
    %3 = vector.load %arg2[%c0, %c0_1, %c0_2] : memref<8x16x128xbf16, #tpu.memory_space<vmem>>, vector<8x16x128xbf16>
    %4 = vector.shape_cast %3 : vector<8x16x128xbf16> to vector<128x128xbf16>
    %c0_3 = arith.constant 0 : index
    %c0_4 = arith.constant 0 : index
    %5 = vector.load %arg3[%c0_3, %c0_4] : memref<128x512xbf16, #tpu.memory_space<vmem>>, vector<128x512xbf16>
    %cst = arith.constant dense<0.000000e+00> : vector<128x512xf32>
    %6 = tpu.matmul %4, %5, %cst {dimension_numbers = #tpu.dot_dimension_numbers<[1], [0], [0], [1], [0, 0, 1, 1], [], []>} : vector<128x128xbf16>, vector<128x512xbf16>, vector<128x512xf32> -> vector<128x512xf32>
    %c0_5 = arith.constant 0 : index
    %c0_6 = arith.constant 0 : index
    %7 = vector.load %arg5[%c0_5, %c0_6] : memref<1x512xf32, #tpu.memory_space<vmem>>, vector<1x512xf32>
    %8 = vector.broadcast %7 : vector<1x512xf32> to vector<128x512xf32>
    %9 = arith.addf %6, %8 : vector<128x512xf32>
    %10 = vector.shape_cast %9 : vector<128x512xf32> to vector<8x16x512xf32>
    %c0_7 = arith.constant 0 : index
    %c0_8 = arith.constant 0 : index
    %c0_9 = arith.constant 0 : index
    %11 = vector.load %arg9[%c0_7, %c0_8, %c0_9] : memref<8x16x512xf32, #tpu.memory_space<vmem>>, vector<8x16x512xf32>
    tpu.vector_store %arg9[%c0_7, %c0_8, %c0_9], %10 {strides = array<i32>} : memref<8x16x512xf32, #tpu.memory_space<vmem>>, vector<8x16x512xf32>,
    %c0_10 = arith.constant 0 : index
    %c0_11 = arith.constant 0 : index
    %12 = vector.load %arg4[%c0_10, %c0_11] : memref<128x512xbf16, #tpu.memory_space<vmem>>, vector<128x512xbf16>
    %c0_12 = arith.constant 0 : index
    %c0_13 = arith.constant 0 : index
    %13 = vector.load %arg7[%c0_12, %c0_13] : memref<16x128xf32, #tpu.memory_space<vmem>>, vector<16x128xf32>
    %c0_14 = arith.constant 0 : index
    %c0_15 = arith.constant 0 : index
    %14 = vector.load %arg8[%c0_14, %c0_15] : memref<16x128xf32, #tpu.memory_space<vmem>>, vector<16x128xf32>
    %c0_i32_16 = arith.constant 0 : i32
    %15 = arith.index_cast %c0_i32_16 : i32 to index
    %c0_17 = arith.constant 0 : index
    %c0_18 = arith.constant 0 : index
    %16 = vector.load %arg9[%15, %c0_17, %c0_18] : memref<8x16x512xf32, #tpu.memory_space<vmem>>, vector<1x16x512xf32>
    %17 = vector.shape_cast %16 : vector<1x16x512xf32> to vector<16x512xf32>
    %18 = arith.truncf %13 : vector<16x128xf32> to vector<16x128xbf16>
    %cst_19 = arith.constant dense<0.000000e+00> : vector<16x512xf32>
    %19 = tpu.matmul %18, %12, %cst_19 {dimension_numbers = #tpu.dot_dimension_numbers<[1], [0], [0], [1], [0, 0, 1, 1], [], []>} : vector<16x128xbf16>, vector<128x512xbf16>, vector<16x512xf32> -> vector<16x512xf32>
    %20 = arith.addf %17, %19 : vector<16x512xf32>
    %21 = vector.extract_strided_slice %20 {offsets = [0, 0], sizes = [16, 384], strides = [1, 1]} : vector<16x512xf32> to vector<16x384xf32>
    %22 = arith.negf %21 : vector<16x384xf32>
    %23 = math.exp %22 : vector<16x384xf32>
    %cst_20 = arith.constant 1.000000e+00 : f32
    %24 = vector.broadcast %cst_20 : f32 to vector<16x384xf32>
    %25 = arith.addf %24, %23 : vector<16x384xf32>
    %26 = arith.divf %24, %25 : vector<16x384xf32>
    %27 = vector.extract_strided_slice %26 {offsets = [0, 0], sizes = [16, 128], strides = [1, 1]} : vector<16x384xf32> to vector<16x128xf32>
    %28 = vector.extract_strided_slice %26 {offsets = [0, 128], sizes = [16, 128], strides = [1, 1]} : vector<16x384xf32> to vector<16x128xf32>
    %29 = vector.extract_strided_slice %26 {offsets = [0, 256], sizes = [16, 128], strides = [1, 1]} : vector<16x384xf32> to vector<16x128xf32>
    %30 = vector.extract_strided_slice %20 {offsets = [0, 384], sizes = [16, 128], strides = [1, 1]} : vector<16x512xf32> to vector<16x128xf32>
    %31 = math.tanh %30 : vector<16x128xf32>
    %32 = arith.mulf %28, %14 : vector<16x128xf32>
    %33 = arith.mulf %27, %31 : vector<16x128xf32>
    %34 = arith.addf %32, %33 : vector<16x128xf32>
    %35 = math.tanh %34 : vector<16x128xf32>
    %36 = arith.mulf %29, %35 : vector<16x128xf32>
    %37 = arith.truncf %36 : vector<16x128xf32> to vector<16x128xbf16>
    %38 = arith.index_cast %c0_i32_16 : i32 to index
    %c0_21 = arith.constant 0 : index
    %c0_22 = arith.constant 0 : index
    %39 = vector.load %arg6[%38, %c0_21, %c0_22] : memref<8x16x128xbf16, #tpu.memory_space<vmem>>, vector<1x16x128xbf16>
    %40 = vector.shape_cast %39 : vector<1x16x128xbf16> to vector<16x128xbf16>
    %41 = vector.shape_cast %37 : vector<16x128xbf16> to vector<1x16x128xbf16>
    tpu.vector_store %arg6[%38, %c0_21, %c0_22], %41 {strides = array<i32>} : memref<8x16x128xbf16, #tpu.memory_space<vmem>>, vector<1x16x128xbf16>,
    %c1_i32 = arith.constant 1 : i32
    %42 = arith.index_cast %c1_i32 : i32 to index
    %c0_23 = arith.constant 0 : index
    %c0_24 = arith.constant 0 : index
    %43 = vector.load %arg9[%42, %c0_23, %c0_24] : memref<8x16x512xf32, #tpu.memory_space<vmem>>, vector<1x16x512xf32>
    %44 = vector.shape_cast %43 : vector<1x16x512xf32> to vector<16x512xf32>
    %45 = arith.truncf %36 : vector<16x128xf32> to vector<16x128xbf16>
    %cst_25 = arith.constant dense<0.000000e+00> : vector<16x512xf32>
    %46 = tpu.matmul %45, %12, %cst_25 {dimension_numbers = #tpu.dot_dimension_numbers<[1], [0], [0], [1], [0, 0, 1, 1], [], []>} : vector<16x128xbf16>, vector<128x512xbf16>, vector<16x512xf32> -> vector<16x512xf32>
    %47 = arith.addf %44, %46 : vector<16x512xf32>
    %48 = vector.extract_strided_slice %47 {offsets = [0, 0], sizes = [16, 384], strides = [1, 1]} : vector<16x512xf32> to vector<16x384xf32>
    %49 = arith.negf %48 : vector<16x384xf32>
    %50 = math.exp %49 : vector<16x384xf32>
    %cst_26 = arith.constant 1.000000e+00 : f32
    %51 = vector.broadcast %cst_26 : f32 to vector<16x384xf32>
    %52 = arith.addf %51, %50 : vector<16x384xf32>
    %53 = arith.divf %51, %52 : vector<16x384xf32>
    %54 = vector.extract_strided_slice %53 {offsets = [0, 0], sizes = [16, 128], strides = [1, 1]} : vector<16x384xf32> to vector<16x128xf32>
    %55 = vector.extract_strided_slice %53 {offsets = [0, 128], sizes = [16, 128], strides = [1, 1]} : vector<16x384xf32> to vector<16x128xf32>
    %56 = vector.extract_strided_slice %53 {offsets = [0, 256], sizes = [16, 128], strides = [1, 1]} : vector<16x384xf32> to vector<16x128xf32>
    %57 = vector.extract_strided_slice %47 {offsets = [0, 384], sizes = [16, 128], strides = [1, 1]} : vector<16x512xf32> to vector<16x128xf32>
    %58 = math.tanh %57 : vector<16x128xf32>
    %59 = arith.mulf %55, %34 : vector<16x128xf32>
    %60 = arith.mulf %54, %58 : vector<16x128xf32>
    %61 = arith.addf %59, %60 : vector<16x128xf32>
    %62 = math.tanh %61 : vector<16x128xf32>
    %63 = arith.mulf %56, %62 : vector<16x128xf32>
    %64 = arith.truncf %63 : vector<16x128xf32> to vector<16x128xbf16>
    %65 = arith.index_cast %c1_i32 : i32 to index
    %c0_27 = arith.constant 0 : index
    %c0_28 = arith.constant 0 : index
    %66 = vector.load %arg6[%65, %c0_27, %c0_28] : memref<8x16x128xbf16, #tpu.memory_space<vmem>>, vector<1x16x128xbf16>
    %67 = vector.shape_cast %66 : vector<1x16x128xbf16> to vector<16x128xbf16>
    %68 = vector.shape_cast %64 : vector<16x128xbf16> to vector<1x16x128xbf16>
    tpu.vector_store %arg6[%65, %c0_27, %c0_28], %68 {strides = array<i32>} : memref<8x16x128xbf16, #tpu.memory_space<vmem>>, vector<1x16x128xbf16>,
    %c2_i32 = arith.constant 2 : i32
    %69 = arith.index_cast %c2_i32 : i32 to index
    %c0_29 = arith.constant 0 : index
    %c0_30 = arith.constant 0 : index
    %70 = vector.load %arg9[%69, %c0_29, %c0_30] : memref<8x16x512xf32, #tpu.memory_space<vmem>>, vector<1x16x512xf32>
    %71 = vector.shape_cast %70 : vector<1x16x512xf32> to vector<16x512xf32>
    %72 = arith.truncf %63 : vector<16x128xf32> to vector<16x128xbf16>
    %cst_31 = arith.constant dense<0.000000e+00> : vector<16x512xf32>
    %73 = tpu.matmul %72, %12, %cst_31 {dimension_numbers = #tpu.dot_dimension_numbers<[1], [0], [0], [1], [0, 0, 1, 1], [], []>} : vector<16x128xbf16>, vector<128x512xbf16>, vector<16x512xf32> -> vector<16x512xf32>
    %74 = arith.addf %71, %73 : vector<16x512xf32>
    %75 = vector.extract_strided_slice %74 {offsets = [0, 0], sizes = [16, 384], strides = [1, 1]} : vector<16x512xf32> to vector<16x384xf32>
    %76 = arith.negf %75 : vector<16x384xf32>
    %77 = math.exp %76 : vector<16x384xf32>
    %cst_32 = arith.constant 1.000000e+00 : f32
    %78 = vector.broadcast %cst_32 : f32 to vector<16x384xf32>
    %79 = arith.addf %78, %77 : vector<16x384xf32>
    %80 = arith.divf %78, %79 : vector<16x384xf32>
    %81 = vector.extract_strided_slice %80 {offsets = [0, 0], sizes = [16, 128], strides = [1, 1]} : vector<16x384xf32> to vector<16x128xf32>
    %82 = vector.extract_strided_slice %80 {offsets = [0, 128], sizes = [16, 128], strides = [1, 1]} : vector<16x384xf32> to vector<16x128xf32>
    %83 = vector.extract_strided_slice %80 {offsets = [0, 256], sizes = [16, 128], strides = [1, 1]} : vector<16x384xf32> to vector<16x128xf32>
    %84 = vector.extract_strided_slice %74 {offsets = [0, 384], sizes = [16, 128], strides = [1, 1]} : vector<16x512xf32> to vector<16x128xf32>
    %85 = math.tanh %84 : vector<16x128xf32>
    %86 = arith.mulf %82, %61 : vector<16x128xf32>
    %87 = arith.mulf %81, %85 : vector<16x128xf32>
    %88 = arith.addf %86, %87 : vector<16x128xf32>
    %89 = math.tanh %88 : vector<16x128xf32>
    %90 = arith.mulf %83, %89 : vector<16x128xf32>
    %91 = arith.truncf %90 : vector<16x128xf32> to vector<16x128xbf16>
    %92 = arith.index_cast %c2_i32 : i32 to index
    %c0_33 = arith.constant 0 : index
    %c0_34 = arith.constant 0 : index
    %93 = vector.load %arg6[%92, %c0_33, %c0_34] : memref<8x16x128xbf16, #tpu.memory_space<vmem>>, vector<1x16x128xbf16>
    %94 = vector.shape_cast %93 : vector<1x16x128xbf16> to vector<16x128xbf16>
    %95 = vector.shape_cast %91 : vector<16x128xbf16> to vector<1x16x128xbf16>
    tpu.vector_store %arg6[%92, %c0_33, %c0_34], %95 {strides = array<i32>} : memref<8x16x128xbf16, #tpu.memory_space<vmem>>, vector<1x16x128xbf16>,
    %c3_i32 = arith.constant 3 : i32
    %96 = arith.index_cast %c3_i32 : i32 to index
    %c0_35 = arith.constant 0 : index
    %c0_36 = arith.constant 0 : index
    %97 = vector.load %arg9[%96, %c0_35, %c0_36] : memref<8x16x512xf32, #tpu.memory_space<vmem>>, vector<1x16x512xf32>
    %98 = vector.shape_cast %97 : vector<1x16x512xf32> to vector<16x512xf32>
    %99 = arith.truncf %90 : vector<16x128xf32> to vector<16x128xbf16>
    %cst_37 = arith.constant dense<0.000000e+00> : vector<16x512xf32>
    %100 = tpu.matmul %99, %12, %cst_37 {dimension_numbers = #tpu.dot_dimension_numbers<[1], [0], [0], [1], [0, 0, 1, 1], [], []>} : vector<16x128xbf16>, vector<128x512xbf16>, vector<16x512xf32> -> vector<16x512xf32>
    %101 = arith.addf %98, %100 : vector<16x512xf32>
    %102 = vector.extract_strided_slice %101 {offsets = [0, 0], sizes = [16, 384], strides = [1, 1]} : vector<16x512xf32> to vector<16x384xf32>
    %103 = arith.negf %102 : vector<16x384xf32>
    %104 = math.exp %103 : vector<16x384xf32>
    %cst_38 = arith.constant 1.000000e+00 : f32
    %105 = vector.broadcast %cst_38 : f32 to vector<16x384xf32>
    %106 = arith.addf %105, %104 : vector<16x384xf32>
    %107 = arith.divf %105, %106 : vector<16x384xf32>
    %108 = vector.extract_strided_slice %107 {offsets = [0, 0], sizes = [16, 128], strides = [1, 1]} : vector<16x384xf32> to vector<16x128xf32>
    %109 = vector.extract_strided_slice %107 {offsets = [0, 128], sizes = [16, 128], strides = [1, 1]} : vector<16x384xf32> to vector<16x128xf32>
    %110 = vector.extract_strided_slice %107 {offsets = [0, 256], sizes = [16, 128], strides = [1, 1]} : vector<16x384xf32> to vector<16x128xf32>
    %111 = vector.extract_strided_slice %101 {offsets = [0, 384], sizes = [16, 128], strides = [1, 1]} : vector<16x512xf32> to vector<16x128xf32>
    %112 = math.tanh %111 : vector<16x128xf32>
    %113 = arith.mulf %109, %88 : vector<16x128xf32>
    %114 = arith.mulf %108, %112 : vector<16x128xf32>
    %115 = arith.addf %113, %114 : vector<16x128xf32>
    %116 = math.tanh %115 : vector<16x128xf32>
    %117 = arith.mulf %110, %116 : vector<16x128xf32>
    %118 = arith.truncf %117 : vector<16x128xf32> to vector<16x128xbf16>
    %119 = arith.index_cast %c3_i32 : i32 to index
    %c0_39 = arith.constant 0 : index
    %c0_40 = arith.constant 0 : index
    %120 = vector.load %arg6[%119, %c0_39, %c0_40] : memref<8x16x128xbf16, #tpu.memory_space<vmem>>, vector<1x16x128xbf16>
    %121 = vector.shape_cast %120 : vector<1x16x128xbf16> to vector<16x128xbf16>
    %122 = vector.shape_cast %118 : vector<16x128xbf16> to vector<1x16x128xbf16>
    tpu.vector_store %arg6[%119, %c0_39, %c0_40], %122 {strides = array<i32>} : memref<8x16x128xbf16, #tpu.memory_space<vmem>>, vector<1x16x128xbf16>,
    %c4_i32 = arith.constant 4 : i32
    %123 = arith.index_cast %c4_i32 : i32 to index
    %c0_41 = arith.constant 0 : index
    %c0_42 = arith.constant 0 : index
    %124 = vector.load %arg9[%123, %c0_41, %c0_42] : memref<8x16x512xf32, #tpu.memory_space<vmem>>, vector<1x16x512xf32>
    %125 = vector.shape_cast %124 : vector<1x16x512xf32> to vector<16x512xf32>
    %126 = arith.truncf %117 : vector<16x128xf32> to vector<16x128xbf16>
    %cst_43 = arith.constant dense<0.000000e+00> : vector<16x512xf32>
    %127 = tpu.matmul %126, %12, %cst_43 {dimension_numbers = #tpu.dot_dimension_numbers<[1], [0], [0], [1], [0, 0, 1, 1], [], []>} : vector<16x128xbf16>, vector<128x512xbf16>, vector<16x512xf32> -> vector<16x512xf32>
    %128 = arith.addf %125, %127 : vector<16x512xf32>
    %129 = vector.extract_strided_slice %128 {offsets = [0, 0], sizes = [16, 384], strides = [1, 1]} : vector<16x512xf32> to vector<16x384xf32>
    %130 = arith.negf %129 : vector<16x384xf32>
    %131 = math.exp %130 : vector<16x384xf32>
    %cst_44 = arith.constant 1.000000e+00 : f32
    %132 = vector.broadcast %cst_44 : f32 to vector<16x384xf32>
    %133 = arith.addf %132, %131 : vector<16x384xf32>
    %134 = arith.divf %132, %133 : vector<16x384xf32>
    %135 = vector.extract_strided_slice %134 {offsets = [0, 0], sizes = [16, 128], strides = [1, 1]} : vector<16x384xf32> to vector<16x128xf32>
    %136 = vector.extract_strided_slice %134 {offsets = [0, 128], sizes = [16, 128], strides = [1, 1]} : vector<16x384xf32> to vector<16x128xf32>
    %137 = vector.extract_strided_slice %134 {offsets = [0, 256], sizes = [16, 128], strides = [1, 1]} : vector<16x384xf32> to vector<16x128xf32>
    %138 = vector.extract_strided_slice %128 {offsets = [0, 384], sizes = [16, 128], strides = [1, 1]} : vector<16x512xf32> to vector<16x128xf32>
    %139 = math.tanh %138 : vector<16x128xf32>
    %140 = arith.mulf %136, %115 : vector<16x128xf32>
    %141 = arith.mulf %135, %139 : vector<16x128xf32>
    %142 = arith.addf %140, %141 : vector<16x128xf32>
    %143 = math.tanh %142 : vector<16x128xf32>
    %144 = arith.mulf %137, %143 : vector<16x128xf32>
    %145 = arith.truncf %144 : vector<16x128xf32> to vector<16x128xbf16>
    %146 = arith.index_cast %c4_i32 : i32 to index
    %c0_45 = arith.constant 0 : index
    %c0_46 = arith.constant 0 : index
    %147 = vector.load %arg6[%146, %c0_45, %c0_46] : memref<8x16x128xbf16, #tpu.memory_space<vmem>>, vector<1x16x128xbf16>
    %148 = vector.shape_cast %147 : vector<1x16x128xbf16> to vector<16x128xbf16>
    %149 = vector.shape_cast %145 : vector<16x128xbf16> to vector<1x16x128xbf16>
    tpu.vector_store %arg6[%146, %c0_45, %c0_46], %149 {strides = array<i32>} : memref<8x16x128xbf16, #tpu.memory_space<vmem>>, vector<1x16x128xbf16>,
    %c5_i32 = arith.constant 5 : i32
    %150 = arith.index_cast %c5_i32 : i32 to index
    %c0_47 = arith.constant 0 : index
    %c0_48 = arith.constant 0 : index
    %151 = vector.load %arg9[%150, %c0_47, %c0_48] : memref<8x16x512xf32, #tpu.memory_space<vmem>>, vector<1x16x512xf32>
    %152 = vector.shape_cast %151 : vector<1x16x512xf32> to vector<16x512xf32>
    %153 = arith.truncf %144 : vector<16x128xf32> to vector<16x128xbf16>
    %cst_49 = arith.constant dense<0.000000e+00> : vector<16x512xf32>
    %154 = tpu.matmul %153, %12, %cst_49 {dimension_numbers = #tpu.dot_dimension_numbers<[1], [0], [0], [1], [0, 0, 1, 1], [], []>} : vector<16x128xbf16>, vector<128x512xbf16>, vector<16x512xf32> -> vector<16x512xf32>
    %155 = arith.addf %152, %154 : vector<16x512xf32>
    %156 = vector.extract_strided_slice %155 {offsets = [0, 0], sizes = [16, 384], strides = [1, 1]} : vector<16x512xf32> to vector<16x384xf32>
    %157 = arith.negf %156 : vector<16x384xf32>
    %158 = math.exp %157 : vector<16x384xf32>
    %cst_50 = arith.constant 1.000000e+00 : f32
    %159 = vector.broadcast %cst_50 : f32 to vector<16x384xf32>
    %160 = arith.addf %159, %158 : vector<16x384xf32>
    %161 = arith.divf %159, %160 : vector<16x384xf32>
    %162 = vector.extract_strided_slice %161 {offsets = [0, 0], sizes = [16, 128], strides = [1, 1]} : vector<16x384xf32> to vector<16x128xf32>
    %163 = vector.extract_strided_slice %161 {offsets = [0, 128], sizes = [16, 128], strides = [1, 1]} : vector<16x384xf32> to vector<16x128xf32>
    %164 = vector.extract_strided_slice %161 {offsets = [0, 256], sizes = [16, 128], strides = [1, 1]} : vector<16x384xf32> to vector<16x128xf32>
    %165 = vector.extract_strided_slice %155 {offsets = [0, 384], sizes = [16, 128], strides = [1, 1]} : vector<16x512xf32> to vector<16x128xf32>
    %166 = math.tanh %165 : vector<16x128xf32>
    %167 = arith.mulf %163, %142 : vector<16x128xf32>
    %168 = arith.mulf %162, %166 : vector<16x128xf32>
    %169 = arith.addf %167, %168 : vector<16x128xf32>
    %170 = math.tanh %169 : vector<16x128xf32>
    %171 = arith.mulf %164, %170 : vector<16x128xf32>
    %172 = arith.truncf %171 : vector<16x128xf32> to vector<16x128xbf16>
    %173 = arith.index_cast %c5_i32 : i32 to index
    %c0_51 = arith.constant 0 : index
    %c0_52 = arith.constant 0 : index
    %174 = vector.load %arg6[%173, %c0_51, %c0_52] : memref<8x16x128xbf16, #tpu.memory_space<vmem>>, vector<1x16x128xbf16>
    %175 = vector.shape_cast %174 : vector<1x16x128xbf16> to vector<16x128xbf16>
    %176 = vector.shape_cast %172 : vector<16x128xbf16> to vector<1x16x128xbf16>
    tpu.vector_store %arg6[%173, %c0_51, %c0_52], %176 {strides = array<i32>} : memref<8x16x128xbf16, #tpu.memory_space<vmem>>, vector<1x16x128xbf16>,
    %c6_i32 = arith.constant 6 : i32
    %177 = arith.index_cast %c6_i32 : i32 to index
    %c0_53 = arith.constant 0 : index
    %c0_54 = arith.constant 0 : index
    %178 = vector.load %arg9[%177, %c0_53, %c0_54] : memref<8x16x512xf32, #tpu.memory_space<vmem>>, vector<1x16x512xf32>
    %179 = vector.shape_cast %178 : vector<1x16x512xf32> to vector<16x512xf32>
    %180 = arith.truncf %171 : vector<16x128xf32> to vector<16x128xbf16>
    %cst_55 = arith.constant dense<0.000000e+00> : vector<16x512xf32>
    %181 = tpu.matmul %180, %12, %cst_55 {dimension_numbers = #tpu.dot_dimension_numbers<[1], [0], [0], [1], [0, 0, 1, 1], [], []>} : vector<16x128xbf16>, vector<128x512xbf16>, vector<16x512xf32> -> vector<16x512xf32>
    %182 = arith.addf %179, %181 : vector<16x512xf32>
    %183 = vector.extract_strided_slice %182 {offsets = [0, 0], sizes = [16, 384], strides = [1, 1]} : vector<16x512xf32> to vector<16x384xf32>
    %184 = arith.negf %183 : vector<16x384xf32>
    %185 = math.exp %184 : vector<16x384xf32>
    %cst_56 = arith.constant 1.000000e+00 : f32
    %186 = vector.broadcast %cst_56 : f32 to vector<16x384xf32>
    %187 = arith.addf %186, %185 : vector<16x384xf32>
    %188 = arith.divf %186, %187 : vector<16x384xf32>
    %189 = vector.extract_strided_slice %188 {offsets = [0, 0], sizes = [16, 128], strides = [1, 1]} : vector<16x384xf32> to vector<16x128xf32>
    %190 = vector.extract_strided_slice %188 {offsets = [0, 128], sizes = [16, 128], strides = [1, 1]} : vector<16x384xf32> to vector<16x128xf32>
    %191 = vector.extract_strided_slice %188 {offsets = [0, 256], sizes = [16, 128], strides = [1, 1]} : vector<16x384xf32> to vector<16x128xf32>
    %192 = vector.extract_strided_slice %182 {offsets = [0, 384], sizes = [16, 128], strides = [1, 1]} : vector<16x512xf32> to vector<16x128xf32>
    %193 = math.tanh %192 : vector<16x128xf32>
    %194 = arith.mulf %190, %169 : vector<16x128xf32>
    %195 = arith.mulf %189, %193 : vector<16x128xf32>
    %196 = arith.addf %194, %195 : vector<16x128xf32>
    %197 = math.tanh %196 : vector<16x128xf32>
    %198 = arith.mulf %191, %197 : vector<16x128xf32>
    %199 = arith.truncf %198 : vector<16x128xf32> to vector<16x128xbf16>
    %200 = arith.index_cast %c6_i32 : i32 to index
    %c0_57 = arith.constant 0 : index
    %c0_58 = arith.constant 0 : index
    %201 = vector.load %arg6[%200, %c0_57, %c0_58] : memref<8x16x128xbf16, #tpu.memory_space<vmem>>, vector<1x16x128xbf16>
    %202 = vector.shape_cast %201 : vector<1x16x128xbf16> to vector<16x128xbf16>
    %203 = vector.shape_cast %199 : vector<16x128xbf16> to vector<1x16x128xbf16>
    tpu.vector_store %arg6[%200, %c0_57, %c0_58], %203 {strides = array<i32>} : memref<8x16x128xbf16, #tpu.memory_space<vmem>>, vector<1x16x128xbf16>,
    %c7_i32 = arith.constant 7 : i32
    %204 = arith.index_cast %c7_i32 : i32 to index
    %c0_59 = arith.constant 0 : index
    %c0_60 = arith.constant 0 : index
    %205 = vector.load %arg9[%204, %c0_59, %c0_60] : memref<8x16x512xf32, #tpu.memory_space<vmem>>, vector<1x16x512xf32>
    %206 = vector.shape_cast %205 : vector<1x16x512xf32> to vector<16x512xf32>
    %207 = arith.truncf %198 : vector<16x128xf32> to vector<16x128xbf16>
    %cst_61 = arith.constant dense<0.000000e+00> : vector<16x512xf32>
    %208 = tpu.matmul %207, %12, %cst_61 {dimension_numbers = #tpu.dot_dimension_numbers<[1], [0], [0], [1], [0, 0, 1, 1], [], []>} : vector<16x128xbf16>, vector<128x512xbf16>, vector<16x512xf32> -> vector<16x512xf32>
    %209 = arith.addf %206, %208 : vector<16x512xf32>
    %210 = vector.extract_strided_slice %209 {offsets = [0, 0], sizes = [16, 384], strides = [1, 1]} : vector<16x512xf32> to vector<16x384xf32>
    %211 = arith.negf %210 : vector<16x384xf32>
    %212 = math.exp %211 : vector<16x384xf32>
    %cst_62 = arith.constant 1.000000e+00 : f32
    %213 = vector.broadcast %cst_62 : f32 to vector<16x384xf32>
    %214 = arith.addf %213, %212 : vector<16x384xf32>
    %215 = arith.divf %213, %214 : vector<16x384xf32>
    %216 = vector.extract_strided_slice %215 {offsets = [0, 0], sizes = [16, 128], strides = [1, 1]} : vector<16x384xf32> to vector<16x128xf32>
    %217 = vector.extract_strided_slice %215 {offsets = [0, 128], sizes = [16, 128], strides = [1, 1]} : vector<16x384xf32> to vector<16x128xf32>
    %218 = vector.extract_strided_slice %215 {offsets = [0, 256], sizes = [16, 128], strides = [1, 1]} : vector<16x384xf32> to vector<16x128xf32>
    %219 = vector.extract_strided_slice %209 {offsets = [0, 384], sizes = [16, 128], strides = [1, 1]} : vector<16x512xf32> to vector<16x128xf32>
    %220 = math.tanh %219 : vector<16x128xf32>
    %221 = arith.mulf %217, %196 : vector<16x128xf32>
    %222 = arith.mulf %216, %220 : vector<16x128xf32>
    %223 = arith.addf %221, %222 : vector<16x128xf32>
    %224 = math.tanh %223 : vector<16x128xf32>
    %225 = arith.mulf %218, %224 : vector<16x128xf32>
    %226 = arith.truncf %225 : vector<16x128xf32> to vector<16x128xbf16>
    %227 = arith.index_cast %c7_i32 : i32 to index
    %c0_63 = arith.constant 0 : index
    %c0_64 = arith.constant 0 : index
    %228 = vector.load %arg6[%227, %c0_63, %c0_64] : memref<8x16x128xbf16, #tpu.memory_space<vmem>>, vector<1x16x128xbf16>
    %229 = vector.shape_cast %228 : vector<1x16x128xbf16> to vector<16x128xbf16>
    %230 = vector.shape_cast %226 : vector<16x128xbf16> to vector<1x16x128xbf16>
    tpu.vector_store %arg6[%227, %c0_63, %c0_64], %230 {strides = array<i32>} : memref<8x16x128xbf16, #tpu.memory_space<vmem>>, vector<1x16x128xbf16>,
    %c8_i32 = arith.constant 8 : i32
    %c0_65 = arith.constant 0 : index
    %c0_66 = arith.constant 0 : index
    %231 = vector.load %arg7[%c0_65, %c0_66] : memref<16x128xf32, #tpu.memory_space<vmem>>, vector<16x128xf32>
    tpu.vector_store %arg7[%c0_65, %c0_66], %225 {strides = array<i32>} : memref<16x128xf32, #tpu.memory_space<vmem>>, vector<16x128xf32>,
    %c0_67 = arith.constant 0 : index
    %c0_68 = arith.constant 0 : index
    %232 = vector.load %arg8[%c0_67, %c0_68] : memref<16x128xf32, #tpu.memory_space<vmem>>, vector<16x128xf32>
    tpu.vector_store %arg8[%c0_67, %c0_68], %223 {strides = array<i32>} : memref<16x128xf32, #tpu.memory_space<vmem>>, vector<16x128xf32>,
    return
  }
  func.func @transform_0(%arg0: i32, %arg1: i32) -> (i32, i32, i32) {
    %c0_i32 = arith.constant 0 : i32
    %c0_i32_0 = arith.constant 0 : i32
    return %arg1, %arg0, %c0_i32 : i32, i32, i32
  }
  func.func @transform_1(%arg0: i32, %arg1: i32) -> (i32, i32) {
    %c0_i32 = arith.constant 0 : i32
    %c0_i32_0 = arith.constant 0 : i32
    %c0_i32_1 = arith.constant 0 : i32
    return %c0_i32, %c0_i32_0 : i32, i32
  }
  func.func @transform_2(%arg0: i32, %arg1: i32) -> (i32, i32) {
    %c0_i32 = arith.constant 0 : i32
    %c0_i32_0 = arith.constant 0 : i32
    %c0_i32_1 = arith.constant 0 : i32
    return %c0_i32, %c0_i32_0 : i32, i32
  }
  func.func @transform_3(%arg0: i32, %arg1: i32) -> (i32, i32) {
    %c0_i32 = arith.constant 0 : i32
    %c0_i32_0 = arith.constant 0 : i32
    %c0_i32_1 = arith.constant 0 : i32
    return %c0_i32, %c0_i32_0 : i32, i32
  }
  func.func @transform_4(%arg0: i32, %arg1: i32) -> (i32, i32, i32) {
    %c0_i32 = arith.constant 0 : i32
    %c0_i32_0 = arith.constant 0 : i32
    return %arg1, %arg0, %c0_i32 : i32, i32, i32
  }
}

</mosaic_0001>

<bundles_post_ra>
// kernel: tpu_custom_call.1
= control target key start
LH: loop header
LB: loop body
LE: loop exit
PB: predicated region body
PF: predicated region fallthrough
CT: control target
= control target key end

     0   :  { %9 = vsyncpa [#allocation6], 0  ;;  %s3621_s0 = inlined_call_operand.hbm [shape: bf16[8,16,128], index: 0, kind: input, shape index: {}]   ;;  %s3622_s1 = inlined_call_operand.hbm [shape: bf16[128,512], index: 1, kind: input, shape index: {}]   ;;  %s3623_s2 = inlined_call_operand.hbm [shape: bf16[128,512], index: 2, kind: input, shape index: {}]   ;;  %s3624_s3 = inlined_call_operand.vmem [shape: f32[1,512], index: 3, kind: input, shape index: {}]   ;;  %s3625_s4 = inlined_call_operand.hbm [shape: bf16[8,16,128], index: 4, kind: output, shape index: {}]  }
   0x1   :  { %10 = vsyncpa [#allocation9], 0 }
   0x2   :  { %11 = vsyncpa [#allocation7], 0  ;;  %s2829_s15 = smov [#allocation8]  }
   0x3   :  { %s29_s16 = sshll.u32 %s2829_s15, 4  ;;  %s30_s16 = int_to_ptr.vmem [resolvable:$true] %s29_s16 }
   0x4   :  { %s2751_s17 = scalar_lea.vmem %s30_s16, 4096  ;;  %p2756_p1 = scmp.lt.s32.totalorder %s30_s16, %s30_s16 }
   0x5   :  { %p2752_p0 = scmp.ne.s32.totalorder %s30_s16, %s2751_s17  ;;  %p2757_p2 = scmp.lt.s32.totalorder %s2751_s17, %s2751_s17 }
   0x7   :  { %p2758_p3 = por %p2757_p2, %p2756_p1 }
   0x9   :  { %p2759_p4 = pnand %p2758_p3, %p2752_p0 }
   0xb   :  { %2762 = shalt.err (!%p2759_p4)
}
   0xc   :  { %s2830_s18 = smov 256   ;;  %s2831_s19 = smov 16  }
   0xd   :  { %35 = dma.hbm_to_vmem [thread:$0]  %s3622_s1, 4096, %s30_s16, [#allocation9], %s2830_s18, %s2830_s18, %s2831_s19  }
   0xe   :  { %s2832_s22 = smov [#allocation5]  }
   0xf   :  { %s17_s23 = sshll.u32 %s2832_s22, 4  ;;  %s18_s23 = int_to_ptr.vmem [resolvable:$true] %s17_s23 }
  0x10   :  { %s2771_s24 = scalar_lea.vmem %s18_s23, 1024  ;;  %p2776_p6 = scmp.lt.s32.totalorder %s18_s23, %s18_s23 }
  0x11   :  { %p2772_p5 = scmp.ne.s32.totalorder %s18_s23, %s2771_s24  ;;  %p2777_p7 = scmp.lt.s32.totalorder %s2771_s24, %s2771_s24 }
  0x13   :  { %p2778_p8 = por %p2777_p7, %p2776_p6 }
  0x15   :  { %p2779_p9 = pnand %p2778_p8, %p2772_p5 }
  0x17   :  { %2782 = shalt.err (!%p2779_p9)
}
  0x18   :  { %s2833_s25 = smov 64   ;;  %s2834_s26 = smov 4  }
  0x19   :  { %23 = dma.hbm_to_vmem [thread:$0]  %s3621_s0, 1024, %s18_s23, [#allocation6], %s2833_s25, %s2833_s25, %s2834_s26  }
  0x1a   :  { %s2835_s1 = smov [#allocation10]  }
  0x1b   :  { %s41_s29 = sshll.u32 %s2835_s1, 4  ;;  %s42_s29 = int_to_ptr.vmem [resolvable:$true] %s41_s29 }
  0x1c   :  { %s2791_s30 = scalar_lea.vmem %s42_s29, 4096  ;;  %p2796_p11 = scmp.lt.s32.totalorder %s42_s29, %s42_s29 }
  0x1d   :  { %p2792_p10 = scmp.ne.s32.totalorder %s42_s29, %s2791_s30  ;;  %p2797_p12 = scmp.lt.s32.totalorder %s2791_s30, %s2791_s30 }
  0x1f   :  { %p2798_p13 = por %p2797_p12, %p2796_p11 }
  0x21   :  { %p2799_p0 = pnand %p2798_p13, %p2792_p10 }
  0x23   :  { %2802 = shalt.err (!%p2799_p0)
}
  0x24   :  { %47 = dma.hbm_to_vmem [thread:$0]  %s3623_s2, 4096, %s42_s29, [#allocation9], %s2830_s18, %s2830_s18, %s2831_s19  }
  0x25   :  { %2823 = dma.done.wait [#allocation6], 1024  }
  0x26   :  { %2824 = vsyncadd [#allocation6], 4294966272 }
  0x27   :  { %2825 = dma.done.wait [#allocation9], 8192  }
  0x28   :  { %2826 = vsyncadd [#allocation9], 4294959104  ;;  %v3626_v0 = vmov 0   ;;  %v2351_v1 = vld [vmem:[#allocation8 + $0xe4] ss:$16 sps:$4 sm:$0xff]   ;;  %v2403_v43 = vld [vmem:[#allocation5 + $0x8] sm:$0xff]  }
  0x29   :  { %378 = vmatprep.mubr.bf16.mxu0 %v3626_v0  ;;  %491 = vmatprep.mubr.bf16.mxu1 %v3626_v0  ;;  %v2353_v2 = vld [vmem:[#allocation8 + $0xec] ss:$16 sps:$4 sm:$0xff]   ;;  %v2355_v3 = vld [vmem:[#allocation8 + $0xe0] ss:$16 sps:$4 sm:$0xff]   ;;  %v2356_v4 = vld [vmem:[#allocation8 + $0xe8] ss:$16 sps:$4 sm:$0xff]  }
  0x2a   :  { %346 = vmatprep.subr.bf16.mxu0 %v2351_v1  ;;  %459 = vmatprep.subr.bf16.mxu1 %v2353_v2  ;;  %v2357_v5 = vld [vmem:[#allocation8 + $0xc4] ss:$16 sps:$4 sm:$0xff]   ;;  %v2359_v6 = vld [vmem:[#allocation8 + $0xcc] ss:$16 sps:$4 sm:$0xff]   ;;  %v2361_v7 = vld [vmem:[#allocation8 + $0xc0] ss:$16 sps:$4 sm:$0xff]  }
  0x2b   :  { %347 = vmatpush1.bf16.msra.mxu0 %v2355_v3  ;;  %460 = vmatpush1.bf16.msra.mxu1 %v2356_v4  ;;  %v2362_v8 = vld [vmem:[#allocation8 + $0xc8] ss:$16 sps:$4 sm:$0xff]   ;;  %v2363_v9 = vld [vmem:[#allocation8 + $0xa4] ss:$16 sps:$4 sm:$0xff]   ;;  %v2365_v10 = vld [vmem:[#allocation8 + $0xac] ss:$16 sps:$4 sm:$0xff]  }
  0x2c   :  { %348 = vmatprep.subr.bf16.mxu0 %v2357_v5  ;;  %461 = vmatprep.subr.bf16.mxu1 %v2359_v6  ;;  %v2367_v11 = vld [vmem:[#allocation8 + $0xa0] ss:$16 sps:$4 sm:$0xff]   ;;  %v2368_v12 = vld [vmem:[#allocation8 + $0xa8] ss:$16 sps:$4 sm:$0xff]   ;;  %v2369_v13 = vld [vmem:[#allocation8 + $0x84] ss:$16 sps:$4 sm:$0xff]  }
  0x2d   :  { %v2371_v14 = vld [vmem:[#allocation8 + $0x8c] ss:$16 sps:$4 sm:$0xff]   ;;  %v2373_v15 = vld [vmem:[#allocation8 + $0x80] ss:$16 sps:$4 sm:$0xff]   ;;  %v2374_v16 = vld [vmem:[#allocation8 + $0x88] ss:$16 sps:$4 sm:$0xff]  }
  0x2e   :  { %v2375_v17 = vld [vmem:[#allocation8 + $0x64] ss:$16 sps:$4 sm:$0xff]   ;;  %v2377_v18 = vld [vmem:[#allocation8 + $0x6c] ss:$16 sps:$4 sm:$0xff]   ;;  %v2379_v19 = vld [vmem:[#allocation8 + $0x60] ss:$16 sps:$4 sm:$0xff]  }
  0x2f   :  { %349 = vmatpush1.bf16.msra.mxu0 %v2361_v7  ;;  %462 = vmatpush1.bf16.msra.mxu1 %v2362_v8  ;;  %v2380_v20 = vld [vmem:[#allocation8 + $0x68] ss:$16 sps:$4 sm:$0xff]   ;;  %v2381_v21 = vld [vmem:[#allocation8 + $0x44] ss:$16 sps:$4 sm:$0xff]   ;;  %v2383_v22 = vld [vmem:[#allocation8 + $0x4c] ss:$16 sps:$4 sm:$0xff]  }
  0x30   :  { %350 = vmatprep.subr.bf16.mxu0 %v2363_v9  ;;  %463 = vmatprep.subr.bf16.mxu1 %v2365_v10  ;;  %v2385_v23 = vld [vmem:[#allocation8 + $0x40] ss:$16 sps:$4 sm:$0xff]   ;;  %v2386_v24 = vld [vmem:[#allocation8 + $0x48] ss:$16 sps:$4 sm:$0xff]   ;;  %v2387_v25 = vld [vmem:[#allocation8 + $0x24] ss:$16 sps:$4 sm:$0xff]  }
  0x31   :  { %v2389_v26 = vld [vmem:[#allocation8 + $0x2c] ss:$16 sps:$4 sm:$0xff]   ;;  %v2391_v27 = vld [vmem:[#allocation8 + $0x20] ss:$16 sps:$4 sm:$0xff]   ;;  %v2392_v28 = vld [vmem:[#allocation8 + $0x28] ss:$16 sps:$4 sm:$0xff]  }
  0x32   :  { %v2393_v29 = vld [vmem:[#allocation8 + $0x4] ss:$16 sps:$4 sm:$0xff]   ;;  %v2395_v30 = vld [vmem:[#allocation8 + $0xc] ss:$16 sps:$4 sm:$0xff]   ;;  %v2397_v31 = vld [vmem:[#allocation8] ss:$16 sps:$4 sm:$0xff]  }
  0x33   :  { %351 = vmatpush1.bf16.msra.mxu0 %v2367_v11  ;;  %464 = vmatpush1.bf16.msra.mxu1 %v2368_v12  ;;  %v2398_v32 = vld [vmem:[#allocation8 + $0x8] ss:$16 sps:$4 sm:$0xff]   ;;  %v2878_v33 = vld [vmem:[#allocation10 + $0xe4] ss:$16 sps:$4 sm:$0xff]   ;;  %v2880_v34 = vld [vmem:[#allocation10 + $0xec] ss:$16 sps:$4 sm:$0xff]   ;;  %v118_v11 = vlaneseq }
  0x34   :  { %352 = vmatprep.subr.bf16.mxu0 %v2369_v13  ;;  %465 = vmatprep.subr.bf16.mxu1 %v2371_v14  ;;  %v2399_v35 = vld [vmem:[#allocation5] sm:$0xff]   ;;  %v2888_v38 = vld [vmem:[#allocation10 + $0xe8] ss:$16 sps:$4 sm:$0xff]   ;;  %v2890_v39 = vld [vmem:[#allocation10 + $0xcc] ss:$16 sps:$4 sm:$0xff]   ;;  %v2837_v10 = vmov 0.0|0.0  }
  0x35   :  { %v2882_v36 = vld [vmem:[#allocation10 + $0xe0] ss:$16 sps:$4 sm:$0xff]   ;;  %v2885_v37 = vld [vmem:[#allocation10 + $0xc4] ss:$16 sps:$4 sm:$0xff]   ;;  %v2901_v42 = vld [vmem:[#allocation10 + $0xc8] ss:$16 sps:$4 sm:$0xff]  }
  0x36   :  { %v2894_v40 = vld [vmem:[#allocation10 + $0xc0] ss:$16 sps:$4 sm:$0xff]   ;;  %v2898_v41 = vld [vmem:[#allocation10 + $0xa4] ss:$16 sps:$4 sm:$0xff]   ;;  %v2910_v46 = vld [vmem:[#allocation10 + $0xac] ss:$16 sps:$4 sm:$0xff]  }
  0x37   :  { %353 = vmatpush1.bf16.msra.mxu0 %v2373_v15  ;;  %466 = vmatpush1.bf16.msra.mxu1 %v2374_v16  ;;  %v2905_v44 = vld [vmem:[#allocation10 + $0xa0] ss:$16 sps:$4 sm:$0xff]   ;;  %v2907_v45 = vld [vmem:[#allocation10 + $0x84] ss:$16 sps:$4 sm:$0xff]   ;;  %v2913_v47 = vld [vmem:[#allocation10 + $0xa8] ss:$16 sps:$4 sm:$0xff]  }
  0x38   :  { %354 = vmatprep.subr.bf16.mxu0 %v2375_v17  ;;  %467 = vmatprep.subr.bf16.mxu1 %v2377_v18  ;;  %v2915_v48 = vld [vmem:[#allocation10 + $0x8c] ss:$16 sps:$4 sm:$0xff]   ;;  %v2920_v49 = vld [vmem:[#allocation10 + $0x80] ss:$16 sps:$4 sm:$0xff]   ;;  %v2922_v50 = vld [vmem:[#allocation10 + $0x64] ss:$16 sps:$4 sm:$0xff]  }
  0x39   :  { %v2927_v51 = vld [vmem:[#allocation10 + $0x88] ss:$16 sps:$4 sm:$0xff]   ;;  %v2407_v52 = vld [vmem:[#allocation5 + $0x10] sm:$0xff]   ;;  %v2933_v54 = vld [vmem:[#allocation10 + $0x6c] ss:$16 sps:$4 sm:$0xff]   ;;  %v119_v12 = vshrl.u32 %v118_v11, 7 }
  0x3a   :  { %v2930_v53 = vld [vmem:[#allocation10 + $0x60] ss:$16 sps:$4 sm:$0xff]   ;;  %v2936_v55 = vld [vmem:[#allocation10 + $0x44] ss:$16 sps:$4 sm:$0xff]   ;;  %v2939_v56 = vld [vmem:[#allocation10 + $0x68] ss:$16 sps:$4 sm:$0xff]  }
  0x3b   :  { %355 = vmatpush1.bf16.msra.mxu0 %v2379_v19  ;;  %468 = vmatpush1.bf16.msra.mxu1 %v2380_v20  ;;  %v2941_v57 = vld [vmem:[#allocation10 + $0x4c] ss:$16 sps:$4 sm:$0xff]   ;;  %v2946_v58 = vld [vmem:[#allocation10 + $0x40] ss:$16 sps:$4 sm:$0xff]   ;;  %v2950_v59 = vld [vmem:[#allocation10 + $0x24] ss:$16 sps:$4 sm:$0xff]  }
  0x3c   :  { %356 = vmatprep.subr.bf16.mxu0 %v2381_v21  ;;  %469 = vmatprep.subr.bf16.mxu1 %v2383_v22  ;;  %v2953_v60 = vld [vmem:[#allocation10 + $0x48] ss:$16 sps:$4 sm:$0xff]   ;;  %v2957_v62 = vld [vmem:[#allocation10 + $0x20] ss:$16 sps:$4 sm:$0xff]   ;;  %v2959_v63 = vld [vmem:[#allocation10 + $0x2c] ss:$16 sps:$4 sm:$0xff]  }
  0x3d   :  { %v2414_v61 = vld [vmem:[#allocation5 + $0x18] sm:$0xff]   ;;  %v2963_v1 = vld [vmem:[#allocation10 + $0x4] ss:$16 sps:$4 sm:$0xff]   ;;  %v2973_v4 = vld [vmem:[#allocation10] ss:$16 sps:$4 sm:$0xff]   ;;  %v120_v17 = vsub.s32 0, %v119_v12 }
  0x3e   :  { %v2965_v2 = vld [vmem:[#allocation10 + $0x28] ss:$16 sps:$4 sm:$0xff]   ;;  %v2967_v3 = vld [vmem:[#allocation10 + $0xc] ss:$16 sps:$4 sm:$0xff]   ;;  %v2421_v6 = vld [vmem:[#allocation5 + $0x20] sm:$0xff]   ;;  %v128_v18 = vsub.s32 2, %v119_v12 }
  0x3f   :  { %357 = vmatpush1.bf16.msra.mxu0 %v2385_v23  ;;  %470 = vmatpush1.bf16.msra.mxu1 %v2386_v24  ;;  %v2977_v5 = vld [vmem:[#allocation10 + $0x8] ss:$16 sps:$4 sm:$0xff]   ;;  %v2435_v8 = vld [vmem:[#allocation5 + $0x30] sm:$0xff]   ;;  %v116_v19 = vld [vmem:[%s3624_s3] sm:$0xf]  ;;  %v124_v22 = vsub.s32 1, %v119_v12 }
  0x40   :  { %358 = vmatprep.subr.bf16.mxu0 %v2387_v25  ;;  %471 = vmatprep.subr.bf16.mxu1 %v2389_v26  ;;  %v2428_v7 = vld [vmem:[#allocation5 + $0x28] sm:$0xff]   ;;  %v2445_v9 = vld [vmem:[#allocation5 + $0x38] sm:$0xff]   ;;  %v132_v23 = vsub.s32 3, %v119_v12  ;;  %v3045_v26 = vrot.slane %v116_v19, %v120_v17  ;;  %s2838_s3 = smov [#allocation11]  }
  0x41   :  { %s2136_s7 = sshll.u32 %s2838_s3, 4  ;;  %s2137_s7 = int_to_ptr.vmem [resolvable:$true] %s2136_s7 }
  0x42   :  { %s2803_s8 = scalar_lea.vmem %s2137_s7, 1024  ;;  %p2808_p2 = scmp.lt.s32.totalorder %s2137_s7, %s2137_s7 }
  0x43   :  { %359 = vmatpush1.bf16.msra.mxu0 %v2391_v27  ;;  %472 = vmatpush1.bf16.msra.mxu1 %v2392_v28  ;;  %v3047_v27 = vrot.slane %v116_v19, %v128_v18  ;;  %p2804_p1 = scmp.ne.s32.totalorder %s2137_s7, %s2803_s8  ;;  %p2809_p3 = scmp.lt.s32.totalorder %s2803_s8, %s2803_s8 }
  0x44   :  { %360 = vmatprep.subr.bf16.mxu0 %v2393_v29  ;;  %473 = vmatprep.subr.bf16.mxu1 %v2395_v30  ;;  %v3049_v30 = vrot.slane %v116_v19, %v124_v22 }
  0x45   :  { %p2810_p4 = por %p2809_p3, %p2808_p2 }
  0x47   :  { %361 = vmatpush1.bf16.msra.mxu0 %v2397_v31  ;;  %474 = vmatpush1.bf16.msra.mxu1 %v2398_v32  ;;  %v3051_v31 = vrot.slane %v116_v19, %v132_v23  ;;  %p2811_p5 = pnand %p2810_p4, %p2804_p1 }
  0x48   :  { %841 = vmatprep.subr.bf16.mxu0 %v2878_v33  ;;  %884 = vmatprep.subr.bf16.mxu1 %v2880_v34 }
  0x4a   :  { %379 = vmatmul.mubr.bf16.vlgmr.msra.gmra.mxu0 %v2399_v35  ;;  %492 = vmatmul.mubr.bf16.vlgmr.msra.gmra.mxu1 %v2399_v35 }
  0x4b   :  { %842 = vmatpush1.bf16.msra.mxu0 %v2882_v36  ;;  %388 = vmatprep.mubr.bf16.mxu0 %v3626_v0 }
  0x4c   :  { %501 = vmatprep.mubr.bf16.mxu1 %v3626_v0  ;;  %843 = vmatprep.subr.bf16.mxu0 %v2885_v37 }
  0x4d   :  { %885 = vmatpush1.bf16.msra.mxu1 %v2888_v38 }
  0x4e   :  { %886 = vmatprep.subr.bf16.mxu1 %v2890_v39 }
  0x4f   :  { %844 = vmatpush1.bf16.msra.mxu0 %v2894_v40 }
  0x50   :  { %845 = vmatprep.subr.bf16.mxu0 %v2898_v41 }
  0x51   :  { %887 = vmatpush1.bf16.msra.mxu1 %v2901_v42 }
  0x52   :  { %389 = vmatmul.mubr.bf16.gmra.mxu0 %v2403_v43  ;;  %502 = vmatmul.mubr.bf16.gmra.mxu1 %v2403_v43 }
  0x53   :  { %398 = vmatprep.mubr.bf16.mxu0 %v3626_v0  ;;  %511 = vmatprep.mubr.bf16.mxu1 %v3626_v0 }
  0x54   :  { %846 = vmatpush1.bf16.msra.mxu0 %v2905_v44  ;;  %888 = vmatprep.subr.bf16.mxu1 %v2910_v46 }
  0x55   :  { %847 = vmatprep.subr.bf16.mxu0 %v2907_v45  ;;  %889 = vmatpush1.bf16.msra.mxu1 %v2913_v47 }
  0x56   :  { %890 = vmatprep.subr.bf16.mxu1 %v2915_v48 }
  0x58   :  { %848 = vmatpush1.bf16.msra.mxu0 %v2920_v49 }
  0x59   :  { %849 = vmatprep.subr.bf16.mxu0 %v2922_v50  ;;  %891 = vmatpush1.bf16.msra.mxu1 %v2927_v51 }
  0x5a   :  { %399 = vmatmul.mubr.bf16.gmra.mxu0 %v2407_v52  ;;  %512 = vmatmul.mubr.bf16.gmra.mxu1 %v2407_v52 }
  0x5b   :  { %408 = vmatprep.mubr.bf16.mxu0 %v3626_v0  ;;  %521 = vmatprep.mubr.bf16.mxu1 %v3626_v0 }
  0x5c   :  { %850 = vmatpush1.bf16.msra.mxu0 %v2930_v53  ;;  %892 = vmatprep.subr.bf16.mxu1 %v2933_v54 }
  0x5d   :  { %851 = vmatprep.subr.bf16.mxu0 %v2936_v55  ;;  %893 = vmatpush1.bf16.msra.mxu1 %v2939_v56 }
  0x5e   :  { %894 = vmatprep.subr.bf16.mxu1 %v2941_v57 }
  0x60   :  { %852 = vmatpush1.bf16.msra.mxu0 %v2946_v58 }
  0x61   :  { %853 = vmatprep.subr.bf16.mxu0 %v2950_v59  ;;  %895 = vmatpush1.bf16.msra.mxu1 %v2953_v60 }
  0x62   :  { %409 = vmatmul.mubr.bf16.gmra.mxu0 %v2414_v61  ;;  %522 = vmatmul.mubr.bf16.gmra.mxu1 %v2414_v61 }
  0x63   :  { %418 = vmatprep.mubr.bf16.mxu0 %v3626_v0  ;;  %531 = vmatprep.mubr.bf16.mxu1 %v3626_v0 }
  0x64   :  { %854 = vmatpush1.bf16.msra.mxu0 %v2957_v62  ;;  %896 = vmatprep.subr.bf16.mxu1 %v2959_v63 }
  0x65   :  { %855 = vmatprep.subr.bf16.mxu0 %v2963_v1  ;;  %897 = vmatpush1.bf16.msra.mxu1 %v2965_v2 }
  0x66   :  { %898 = vmatprep.subr.bf16.mxu1 %v2967_v3 }
  0x68   :  { %856 = vmatpush1.bf16.msra.mxu0 %v2973_v4 }
  0x69   :  { %899 = vmatpush1.bf16.msra.mxu1 %v2977_v5  ;;  %1002 = vmatprep.subr.bf16.mxu0 %v2878_v33 }
  0x6a   :  { %419 = vmatmul.mubr.bf16.gmra.mxu0 %v2421_v6  ;;  %532 = vmatmul.mubr.bf16.gmra.mxu1 %v2421_v6 }
  0x6b   :  { %428 = vmatprep.mubr.bf16.mxu0 %v3626_v0  ;;  %541 = vmatprep.mubr.bf16.mxu1 %v3626_v0 }
  0x6c   :  { %1045 = vmatprep.subr.bf16.mxu1 %v2880_v34 }
  0x72   :  { %429 = vmatmul.mubr.bf16.gmra.mxu0 %v2428_v7  ;;  %542 = vmatmul.mubr.bf16.gmra.mxu1 %v2428_v7 }
  0x73   :  { %438 = vmatprep.mubr.bf16.mxu0 %v3626_v0  ;;  %551 = vmatprep.mubr.bf16.mxu1 %v3626_v0 }
  0x7a   :  { %439 = vmatmul.mubr.bf16.gmra.mxu0 %v2435_v8  ;;  %552 = vmatmul.mubr.bf16.gmra.mxu1 %v2435_v8 }
  0x7b   :  { %448 = vmatprep.mubr.bf16.mxu0 %v3626_v0  ;;  %561 = vmatprep.mubr.bf16.mxu1 %v3626_v0 }
  0x82   :  { %449 = vmatmul.mubr.bf16.gmra.mxu0 %v2445_v9  ;;  %562 = vmatmul.mubr.bf16.gmra.mxu1 %v2445_v9 }
  0x83   :  { %873 = vmatprep.mubr.bf16.mxu0 %v3626_v0  ;;  %916 = vmatprep.mubr.bf16.mxu1 %v3626_v0 }
  0x8a   :  { %874 = vmatmul.mubr.bf16.vlgmr.msra.gmra.mxu0 %v2837_v10  ;;  %917 = vmatmul.mubr.bf16.vlgmr.msra.gmra.mxu1 %v2837_v10 }
  0x8b   :  { %1003 = vmatpush1.bf16.msra.mxu0 %v2882_v36  ;;  %1046 = vmatpush1.bf16.msra.mxu1 %v2888_v38 }
  0x8c   :  { %1004 = vmatprep.subr.bf16.mxu0 %v2885_v37  ;;  %1047 = vmatprep.subr.bf16.mxu1 %v2890_v39 }
  0x8d   :  { %1034 = vmatprep.mubr.bf16.mxu0 %v3626_v0  ;;  %1077 = vmatprep.mubr.bf16.mxu1 %v3626_v0 }
  0x8f   :  { %1005 = vmatpush1.bf16.msra.mxu0 %v2894_v40  ;;  %1048 = vmatpush1.bf16.msra.mxu1 %v2901_v42 }
  0x90   :  { %1006 = vmatprep.subr.bf16.mxu0 %v2898_v41  ;;  %1049 = vmatprep.subr.bf16.mxu1 %v2910_v46 }
  0x93   :  { %1007 = vmatpush1.bf16.msra.mxu0 %v2905_v44  ;;  %1050 = vmatpush1.bf16.msra.mxu1 %v2913_v47 }
  0x94   :  { %1008 = vmatprep.subr.bf16.mxu0 %v2907_v45  ;;  %1051 = vmatprep.subr.bf16.mxu1 %v2915_v48 }
  0x97   :  { %1009 = vmatpush1.bf16.msra.mxu0 %v2920_v49  ;;  %1052 = vmatpush1.bf16.msra.mxu1 %v2927_v51 }
  0x98   :  { %1010 = vmatprep.subr.bf16.mxu0 %v2922_v50  ;;  %1053 = vmatprep.subr.bf16.mxu1 %v2933_v54 }
  0x9b   :  { %1011 = vmatpush1.bf16.msra.mxu0 %v2930_v53  ;;  %1054 = vmatpush1.bf16.msra.mxu1 %v2939_v56 }
  0x9c   :  { %1012 = vmatprep.subr.bf16.mxu0 %v2936_v55  ;;  %1055 = vmatprep.subr.bf16.mxu1 %v2941_v57 }
  0x9f   :  { %1013 = vmatpush1.bf16.msra.mxu0 %v2946_v58  ;;  %1056 = vmatpush1.bf16.msra.mxu1 %v2953_v60 }
  0xa0   :  { %1014 = vmatprep.subr.bf16.mxu0 %v2950_v59  ;;  %1057 = vmatprep.subr.bf16.mxu1 %v2959_v63 }
  0xa3   :  { %1015 = vmatpush1.bf16.msra.mxu0 %v2957_v62  ;;  %1058 = vmatpush1.bf16.msra.mxu1 %v2965_v2 }
  0xa4   :  { %1016 = vmatprep.subr.bf16.mxu0 %v2963_v1  ;;  %1059 = vmatprep.subr.bf16.mxu1 %v2967_v3 }
  0xa7   :  { %1017 = vmatpush1.bf16.msra.mxu0 %v2973_v4  ;;  %1060 = vmatpush1.bf16.msra.mxu1 %v2977_v5 }
  0xa8   :  { %1164 = vmatprep.subr.bf16.mxu0 %v2878_v33  ;;  %1207 = vmatprep.subr.bf16.mxu1 %v2880_v34 }
 0x10a   :  { %v3026_v13 = vpop.f32.mrf.mxu0  ;;  %v3028_v14 = vpop.f32.mrf.mxu1 }
 0x10c   :  { %v3030_v15 = vpop.f32.mrf.mxu0  ;;  %v3032_v16 = vpop.f32.mrf.mxu1 }
 0x10e   :  { %v3037_v20 = vpop.f32.mrf.mxu0  ;;  %v3039_v21 = vpop.f32.mrf.mxu1 }
 0x110   :  { %v3041_v24 = vpop.f32.mrf.mxu0  ;;  %v3043_v25 = vpop.f32.mrf.mxu1 }
 0x112   :  { %v390_v28 = vpop.f32.mrf.mxu0  ;;  %v503_v29 = vpop.f32.mrf.mxu1 }
 0x113   :  { %v3054_v32 = vadd.f32 %v390_v28, %v3045_v26  ;;  %v3057_v35 = vadd.f32 %v503_v29, %v3047_v27 }
 0x114   :  { %v392_v43 = vpop.f32.mrf.mxu0  ;;  %v505_v52 = vpop.f32.mrf.mxu1 }
 0x115   :  { %v3060_v61 = vadd.f32 %v392_v43, %v3049_v30  ;;  %v3063_v6 = vadd.f32 %v505_v52, %v3051_v31 }
 0x116   :  { %v394_v7 = vpop.f32.mrf.mxu0  ;;  %v507_v8 = vpop.f32.mrf.mxu1 }
 0x117   :  { %3628 = vst [vmem:[#allocation15_spill] sm:$0xff] %v3063_v6  ;;  %v3066_v9 = vadd.f32 %v394_v7, %v3045_v26  ;;  %v3069_v10 = vadd.f32 %v507_v8, %v3047_v27 }
 0x118   :  { %v396_v11 = vpop.f32.mrf.mxu0  ;;  %v509_v12 = vpop.f32.mrf.mxu1 }
 0x119   :  { %3629 = vst [vmem:[#allocation16_spill] sm:$0xff] %v3069_v10  ;;  %v3072_v17 = vadd.f32 %v396_v11, %v3049_v30  ;;  %v3075_v18 = vadd.f32 %v509_v12, %v3051_v31 }
 0x11a   :  { %v400_v19 = vpop.f32.mrf.mxu0  ;;  %v513_v22 = vpop.f32.mrf.mxu1 }
 0x11b   :  { %3630 = vst [vmem:[#allocation17_spill] sm:$0xff] %v3075_v18  ;;  %v3078_v23 = vadd.f32 %v400_v19, %v3045_v26  ;;  %v3081_v28 = vadd.f32 %v513_v22, %v3047_v27 }
 0x11c   :  { %v402_v29 = vpop.f32.mrf.mxu0  ;;  %v515_v43 = vpop.f32.mrf.mxu1 }
 0x11d   :  { %3631 = vst [vmem:[#allocation18_spill] sm:$0xff] %v3078_v23  ;;  %3632 = vst [vmem:[#allocation19_spill] sm:$0xff] %v3081_v28  ;;  %v3084_v52 = vadd.f32 %v402_v29, %v3049_v30  ;;  %v3087_v7 = vadd.f32 %v515_v43, %v3051_v31 }
 0x11e   :  { %v404_v8 = vpop.f32.mrf.mxu0  ;;  %v517_v11 = vpop.f32.mrf.mxu1 }
 0x11f   :  { %3633 = vst [vmem:[#allocation20_spill] sm:$0xff] %v3084_v52  ;;  %3634 = vst [vmem:[#allocation21_spill] sm:$0xff] %v3087_v7  ;;  %v3090_v12 = vadd.f32 %v404_v8, %v3045_v26  ;;  %v3093_v0 = vadd.f32 %v517_v11, %v3047_v27 }
 0x120   :  { %v406_v19 = vpop.f32.mrf.mxu0  ;;  %v519_v23 = vpop.f32.mrf.mxu1 }
 0x121   :  { %3635 = vst [vmem:[#allocation22_spill] sm:$0xff] %v3090_v12  ;;  %3636 = vst [vmem:[#allocation23_spill] sm:$0xff] %v3093_v0  ;;  %v3096_v22 = vadd.f32 %v406_v19, %v3049_v30  ;;  %v3099_v28 = vadd.f32 %v519_v23, %v3051_v31 }
 0x122   :  { %v410_v29 = vpop.f32.mrf.mxu0  ;;  %v523_v52 = vpop.f32.mrf.mxu1 }
 0x123   :  { %3637 = vst [vmem:[#allocation24_spill] sm:$0xff] %v3096_v22  ;;  %3638 = vst [vmem:[#allocation25_spill] sm:$0xff] %v3099_v28  ;;  %v3102_v43 = vadd.f32 %v410_v29, %v3045_v26  ;;  %v3105_v7 = vadd.f32 %v523_v52, %v3047_v27 }
 0x124   :  { %v412_v8 = vpop.f32.mrf.mxu0  ;;  %v525_v12 = vpop.f32.mrf.mxu1 }
 0x125   :  { %3639 = vst [vmem:[#allocation26_spill] sm:$0xff] %v3102_v43  ;;  %3640 = vst [vmem:[#allocation27_spill] sm:$0xff] %v3105_v7  ;;  %v3108_v11 = vadd.f32 %v412_v8, %v3049_v30  ;;  %v3111_v0 = vadd.f32 %v525_v12, %v3051_v31 }
 0x126   :  { %v414_v19 = vpop.f32.mrf.mxu0  ;;  %v527_v22 = vpop.f32.mrf.mxu1 }
 0x127   :  { %3641 = vst [vmem:[#allocation28_spill] sm:$0xff] %v3108_v11  ;;  %3642 = vst [vmem:[#allocation29_spill] sm:$0xff] %v3111_v0  ;;  %v3114_v23 = vadd.f32 %v414_v19, %v3045_v26  ;;  %v3117_v28 = vadd.f32 %v527_v22, %v3047_v27 }
 0x128   :  { %v416_v29 = vpop.f32.mrf.mxu0  ;;  %v529_v43 = vpop.f32.mrf.mxu1 }
 0x129   :  { %3643 = vst [vmem:[#allocation30_spill] sm:$0xff] %v3114_v23  ;;  %3644 = vst [vmem:[#allocation31_spill] sm:$0xff] %v3117_v28  ;;  %v3120_v52 = vadd.f32 %v416_v29, %v3049_v30  ;;  %v3123_v7 = vadd.f32 %v529_v43, %v3051_v31 }
 0x12a   :  { %v420_v8 = vpop.f32.mrf.mxu0  ;;  %v533_v11 = vpop.f32.mrf.mxu1 }
 0x12b   :  { %3645 = vst [vmem:[#allocation32_spill] sm:$0xff] %v3120_v52  ;;  %3646 = vst [vmem:[#allocation33_spill] sm:$0xff] %v3123_v7  ;;  %v3126_v12 = vadd.f32 %v420_v8, %v3045_v26  ;;  %v3129_v0 = vadd.f32 %v533_v11, %v3047_v27 }
 0x12c   :  { %v422_v19 = vpop.f32.mrf.mxu0  ;;  %v535_v23 = vpop.f32.mrf.mxu1 }
 0x12d   :  { %3647 = vst [vmem:[#allocation34_spill] sm:$0xff] %v3126_v12  ;;  %3648 = vst [vmem:[#allocation35_spill] sm:$0xff] %v3129_v0  ;;  %v3132_v22 = vadd.f32 %v422_v19, %v3049_v30  ;;  %v3135_v28 = vadd.f32 %v535_v23, %v3051_v31 }
 0x12e   :  { %v424_v29 = vpop.f32.mrf.mxu0  ;;  %v537_v52 = vpop.f32.mrf.mxu1 }
 0x12f   :  { %3649 = vst [vmem:[#allocation36_spill] sm:$0xff] %v3132_v22  ;;  %3650 = vst [vmem:[#allocation37_spill] sm:$0xff] %v3135_v28  ;;  %v3138_v43 = vadd.f32 %v424_v29, %v3045_v26  ;;  %v3141_v7 = vadd.f32 %v537_v52, %v3047_v27 }
 0x130   :  { %v426_v8 = vpop.f32.mrf.mxu0  ;;  %v539_v12 = vpop.f32.mrf.mxu1 }
 0x131   :  { %3651 = vst [vmem:[#allocation38_spill] sm:$0xff] %v3138_v43  ;;  %3652 = vst [vmem:[#allocation39_spill] sm:$0xff] %v3141_v7  ;;  %v3144_v11 = vadd.f32 %v426_v8, %v3049_v30  ;;  %v3147_v0 = vadd.f32 %v539_v12, %v3051_v31 }
 0x132   :  { %v430_v19 = vpop.f32.mrf.mxu0  ;;  %v543_v22 = vpop.f32.mrf.mxu1 }
 0x133   :  { %3653 = vst [vmem:[#allocation40_spill] sm:$0xff] %v3144_v11  ;;  %3654 = vst [vmem:[#allocation41_spill] sm:$0xff] %v3147_v0  ;;  %v3150_v23 = vadd.f32 %v430_v19, %v3045_v26  ;;  %v3153_v28 = vadd.f32 %v543_v22, %v3047_v27 }
 0x134   :  { %v432_v29 = vpop.f32.mrf.mxu0  ;;  %v545_v43 = vpop.f32.mrf.mxu1 }
 0x135   :  { %3655 = vst [vmem:[#allocation42_spill] sm:$0xff] %v3150_v23  ;;  %3656 = vst [vmem:[#allocation43_spill] sm:$0xff] %v3153_v28  ;;  %v3156_v52 = vadd.f32 %v432_v29, %v3049_v30  ;;  %v3159_v7 = vadd.f32 %v545_v43, %v3051_v31 }
 0x136   :  { %v434_v8 = vpop.f32.mrf.mxu0  ;;  %v547_v11 = vpop.f32.mrf.mxu1 }
 0x137   :  { %3657 = vst [vmem:[#allocation44_spill] sm:$0xff] %v3156_v52  ;;  %3658 = vst [vmem:[#allocation45_spill] sm:$0xff] %v3159_v7  ;;  %v3162_v12 = vadd.f32 %v434_v8, %v3045_v26  ;;  %v3165_v0 = vadd.f32 %v547_v11, %v3047_v27 }
 0x138   :  { %v436_v19 = vpop.f32.mrf.mxu0  ;;  %v549_v23 = vpop.f32.mrf.mxu1 }
 0x139   :  { %3659 = vst [vmem:[#allocation46_spill] sm:$0xff] %v3162_v12  ;;  %3660 = vst [vmem:[#allocation47_spill] sm:$0xff] %v3165_v0  ;;  %v3168_v22 = vadd.f32 %v436_v19, %v3049_v30  ;;  %v3171_v28 = vadd.f32 %v549_v23, %v3051_v31 }
 0x13a   :  { %v440_v29 = vpop.f32.mrf.mxu0  ;;  %v553_v52 = vpop.f32.mrf.mxu1 }
 0x13b   :  { %3661 = vst [vmem:[#allocation48_spill] sm:$0xff] %v3168_v22  ;;  %3662 = vst [vmem:[#allocation49_spill] sm:$0xff] %v3171_v28  ;;  %v3174_v43 = vadd.f32 %v440_v29, %v3045_v26  ;;  %v3177_v7 = vadd.f32 %v553_v52, %v3047_v27 }
 0x13c   :  { %v442_v8 = vpop.f32.mrf.mxu0  ;;  %v555_v12 = vpop.f32.mrf.mxu1 }
 0x13d   :  { %3663 = vst [vmem:[#allocation50_spill] sm:$0xff] %v3174_v43  ;;  %3664 = vst [vmem:[#allocation51_spill] sm:$0xff] %v3177_v7  ;;  %v3180_v11 = vadd.f32 %v442_v8, %v3049_v30  ;;  %v3183_v0 = vadd.f32 %v555_v12, %v3051_v31 }
 0x13e   :  { %v444_v19 = vpop.f32.mrf.mxu0  ;;  %v557_v22 = vpop.f32.mrf.mxu1 }
 0x13f   :  { %3665 = vst [vmem:[#allocation52_spill] sm:$0xff] %v3180_v11  ;;  %3666 = vst [vmem:[#allocation53_spill] sm:$0xff] %v3183_v0  ;;  %v3186_v23 = vadd.f32 %v444_v19, %v3045_v26  ;;  %v3189_v28 = vadd.f32 %v557_v22, %v3047_v27 }
 0x140   :  { %v446_v29 = vpop.f32.mrf.mxu0  ;;  %v559_v43 = vpop.f32.mrf.mxu1 }
 0x141   :  { %3667 = vst [vmem:[#allocation54_spill] sm:$0xff] %v3186_v23  ;;  %3668 = vst [vmem:[#allocation55_spill] sm:$0xff] %v3189_v28  ;;  %v3192_v52 = vadd.f32 %v446_v29, %v3049_v30  ;;  %v3195_v7 = vadd.f32 %v559_v43, %v3051_v31 }
 0x142   :  { %v450_v8 = vpop.f32.mrf.mxu0  ;;  %v563_v11 = vpop.f32.mrf.mxu1 }
 0x143   :  { %3669 = vst [vmem:[#allocation56_spill] sm:$0xff] %v3192_v52  ;;  %3670 = vst [vmem:[#allocation57_spill] sm:$0xff] %v3195_v7  ;;  %v3198_v12 = vadd.f32 %v450_v8, %v3045_v26  ;;  %v3201_v0 = vadd.f32 %v563_v11, %v3047_v27  ;;  %v381_v11 = vadd.f32 %v3026_v13, %v3045_v26 }
 0x144   :  { %v452_v19 = vpop.f32.mrf.mxu0  ;;  %v565_v23 = vpop.f32.mrf.mxu1  ;;  %v387_v13 = vadd.f32 %v3041_v24, %v3049_v30  ;;  %v498_v24 = vadd.f32 %v3039_v21, %v3047_v27 }
 0x145   :  { %3671 = vst [vmem:[#allocation58_spill] sm:$0xff] %v3198_v12  ;;  %3672 = vst [vmem:[#allocation59_spill] sm:$0xff] %v3201_v0  ;;  %v3204_v22 = vadd.f32 %v452_v19, %v3049_v30  ;;  %v3207_v28 = vadd.f32 %v565_v23, %v3051_v31 }
 0x146   :  { %v454_v29 = vpop.f32.mrf.mxu0  ;;  %v567_v52 = vpop.f32.mrf.mxu1 }
 0x147   :  { %3673 = vst [vmem:[#allocation60_spill] sm:$0xff] %v3204_v22  ;;  %3674 = vst [vmem:[#allocation61_spill] sm:$0xff] %v3207_v28  ;;  %v3210_v43 = vadd.f32 %v454_v29, %v3045_v26  ;;  %v3213_v7 = vadd.f32 %v567_v52, %v3047_v27  ;;  %v383_v28 = vadd.f32 %v3030_v15, %v3049_v30 }
 0x148   :  { %v456_v8 = vpop.f32.mrf.mxu0  ;;  %v569_v12 = vpop.f32.mrf.mxu1  ;;  %v385_v52 = vadd.f32 %v3037_v20, %v3045_v26  ;;  %v494_v20 = vadd.f32 %v3028_v14, %v3047_v27 }
 0x149   :  { %3675 = vst [vmem:[#allocation62_spill] sm:$0xff] %v3210_v43  ;;  %3676 = vst [vmem:[#allocation63_spill] sm:$0xff] %v3213_v7  ;;  %v3218_v0 = vadd.f32 %v456_v8, %v3049_v30  ;;  %v3221_v19 = vadd.f32 %v569_v12, %v3051_v31 }
 0x14a   :  { %v875_v23 = vpop.f32.mrf.mxu0  ;;  %v918_v8 = vpop.f32.mrf.mxu1 }
 0x14b   :  { %3677 = vst [vmem:[#allocation64_spill] sm:$0xff] %v3218_v0  ;;  %3678 = vst [vmem:[#allocation65_spill] sm:$0xff] %v3221_v19  ;;  %v927_v29 = vadd.f32 %v875_v23, %v381_v11  ;;  %v929_v30 = vadd.f32 %v918_v8, %v494_v20 }
 0x14c   :  { %v877_v43 = vpop.f32.mrf.mxu0  ;;  %v920_v15 = vpop.f32.mrf.mxu1 }
 0x14d   :  { %v2221_v7 = vmul.f32 -1.442695, %v927_v29  ;;  %v928_v22 = vadd.f32 %v877_v43, %v383_v28  ;;  %v496_v28 = vadd.f32 %v3032_v16, %v3051_v31 }
 0x14e   :  { %v879_v18 = vpop.f32.mrf.mxu0  ;;  %v922_v26 = vpop.f32.mrf.mxu1 }
 0x14f   :  { %2455 = vpow2.f32 %v2221_v7  ;;  %v2222_v0 = vmul.f32 -1.442695, %v928_v22  ;;  %v931_v12 = vadd.f32 %v879_v18, %v385_v52  ;;  %v930_v18 = vadd.f32 %v920_v15, %v496_v28 }
 0x150   :  { %v881_v19 = vpop.f32.mrf.mxu0  ;;  %v933_v7 = vadd.f32 %v922_v26, %v498_v24  ;;  %v2223_v22 = vmul.f32 -1.442695, %v929_v30 }
 0x151   :  { %2457 = vpow2.f32 %v2222_v0  ;;  %v2224_v6 = vmul.f32 -1.442695, %v931_v12  ;;  %v932_v10 = vadd.f32 %v881_v19, %v387_v13  ;;  %v924_v19 = vpop.f32.mrf.mxu1 }
 0x152   :  { %v2226_v14 = vmul.f32 -1.442695, %v933_v7 }
 0x153   :  { %2459 = vpow2.f32 %v2224_v6  ;;  %v2225_v11 = vmul.f32 -1.442695, %v932_v10  ;;  %v500_v10 = vadd.f32 %v3043_v25, %v3051_v31 }
 0x155   :  { %2461 = vpow2.f32 %v2225_v11  ;;  %v934_v16 = vadd.f32 %v924_v19, %v500_v10 }
 0x156   :  { %2463 = vtanh.f32 %v930_v18 }
 0x15c   :  { %v2456_v0 = vpop.eup %2455 }
 0x15d   :  { %v953_v43 = vadd.f32 1.0, %v2456_v0 }
 0x15e   :  { %v2458_v6 = vpop.eup %2457 }
 0x15f   :  { %2465 = vrcp.f32 %v953_v43  ;;  %v954_v23 = vadd.f32 1.0, %v2458_v6 }
 0x160   :  { %v2460_v29 = vpop.eup %2459  ;;  %2467 = vpow2.f32 %v2223_v22 }
 0x161   :  { %2469 = vrcp.f32 %v954_v23  ;;  %v956_v21 = vadd.f32 1.0, %v2460_v29 }
 0x162   :  { %v2462_v27 = vpop.eup %2461  ;;  %2471 = vpow2.f32 %v2226_v14 }
 0x163   :  { %2473 = vrcp.f32 %v956_v21  ;;  %v957_v52 = vadd.f32 1.0, %v2462_v27  ;;  %v2464_v13 = vpop.eup %2463 }
 0x164   :  { %2475 = vtanh.f32 %v934_v16  ;;  %v3679_v16 = vmov 0  }
 0x165   :  { %2477 = vrcp.f32 %v957_v52 }
 0x16c   :  { %v2466_v8 = vpop.eup %2465 }
 0x16d   :  { %v2468_v12 = vpop.eup %2467  ;;  %v975_v15 = vmul.f32 %v2466_v8, %v2464_v13 }
 0x16e   :  { %v2470_v25 = vpop.eup %2469  ;;  %v955_v26 = vadd.f32 1.0, %v2468_v12 }
 0x16f   :  { %v2472_v31 = vpop.eup %2471  ;;  %v973_v11 = vmul.f32 0.0, %v2470_v25 }
 0x170   :  { %v2474_v20 = vpop.eup %2473  ;;  %v958_v18 = vadd.f32 1.0, %v2472_v31  ;;  %2479 = vrcp.f32 %v955_v26 }
 0x171   :  { %v2476_v28 = vpop.eup %2475  ;;  %v3237_v24 = vadd.f32 %v975_v15, %v973_v11 }
 0x172   :  { %v2478_v30 = vpop.eup %2477  ;;  %v976_v0 = vmul.f32 %v2476_v28, %v2474_v20 }
 0x173   :  { %v974_v7 = vmul.f32 0.0, %v2478_v30  ;;  %2481 = vtanh.f32 %v3237_v24  ;;  %v3680_v30 = vld [vmem:[#allocation16_spill] sm:$0xff] }
 0x174   :  { %2483 = vrcp.f32 %v958_v18 }
 0x175   :  { %v3240_v22 = vadd.f32 %v976_v0, %v974_v7  ;;  %v3681_v7 = vld [vmem:[#allocation15_spill] sm:$0xff] }
 0x177   :  { %2485 = vtanh.f32 %v3240_v22 }
 0x17d   :  { %v2480_v43 = vpop.eup %2479 }
 0x180   :  { %v2482_v19 = vpop.eup %2481 }
 0x181   :  { %v2484_v6 = vpop.eup %2483  ;;  %v981_v14 = vmul.f32 %v2482_v19, %v2480_v43 }
 0x184   :  { %v2486_v10 = vpop.eup %2485 }
 0x185   :  { %v982_v23 = vmul.f32 %v2486_v10, %v2484_v6 }
 0x187   :  { %v983_v29 = vpack.c.bf16 %v982_v23, %v981_v14  ;;  %v3682_v14 = vld [vmem:[#allocation17_spill] sm:$0xff] }
 0x189   :  { %2305 = vst [vmem:[#allocation11] sm:$0xff] %v983_v29   ;;  %1035 = vmatmul.mubr.bf16.vlgmr.msra.gmra.mxu0 %v983_v29  ;;  %1078 = vmatmul.mubr.bf16.vlgmr.msra.gmra.mxu1 %v983_v29 }
 0x18a   :  { %1165 = vmatpush1.bf16.msra.mxu0 %v2882_v36  ;;  %1208 = vmatpush1.bf16.msra.mxu1 %v2888_v38 }
 0x18b   :  { %1166 = vmatprep.subr.bf16.mxu0 %v2885_v37  ;;  %1209 = vmatprep.subr.bf16.mxu1 %v2890_v39 }
 0x18c   :  { %1196 = vmatprep.mubr.bf16.mxu0 %v3679_v16  ;;  %1239 = vmatprep.mubr.bf16.mxu1 %v3679_v16 }
 0x18e   :  { %1167 = vmatpush1.bf16.msra.mxu0 %v2894_v40  ;;  %1210 = vmatpush1.bf16.msra.mxu1 %v2901_v42 }
 0x18f   :  { %1168 = vmatprep.subr.bf16.mxu0 %v2898_v41  ;;  %1211 = vmatprep.subr.bf16.mxu1 %v2910_v46 }
 0x192   :  { %1169 = vmatpush1.bf16.msra.mxu0 %v2905_v44  ;;  %1212 = vmatpush1.bf16.msra.mxu1 %v2913_v47 }
 0x193   :  { %1170 = vmatprep.subr.bf16.mxu0 %v2907_v45  ;;  %1213 = vmatprep.subr.bf16.mxu1 %v2915_v48 }
 0x196   :  { %1171 = vmatpush1.bf16.msra.mxu0 %v2920_v49  ;;  %1214 = vmatpush1.bf16.msra.mxu1 %v2927_v51 }
 0x197   :  { %1172 = vmatprep.subr.bf16.mxu0 %v2922_v50  ;;  %1215 = vmatprep.subr.bf16.mxu1 %v2933_v54 }
 0x19a   :  { %1173 = vmatpush1.bf16.msra.mxu0 %v2930_v53  ;;  %1216 = vmatpush1.bf16.msra.mxu1 %v2939_v56 }
 0x19b   :  { %1174 = vmatprep.subr.bf16.mxu0 %v2936_v55  ;;  %1217 = vmatprep.subr.bf16.mxu1 %v2941_v57 }
 0x19e   :  { %1175 = vmatpush1.bf16.msra.mxu0 %v2946_v58  ;;  %1218 = vmatpush1.bf16.msra.mxu1 %v2953_v60 }
 0x19f   :  { %1176 = vmatprep.subr.bf16.mxu0 %v2950_v59  ;;  %1219 = vmatprep.subr.bf16.mxu1 %v2959_v63 }
 0x1a2   :  { %1177 = vmatpush1.bf16.msra.mxu0 %v2957_v62  ;;  %1220 = vmatpush1.bf16.msra.mxu1 %v2965_v2 }
 0x1a3   :  { %1178 = vmatprep.subr.bf16.mxu0 %v2963_v1  ;;  %1221 = vmatprep.subr.bf16.mxu1 %v2967_v3 }
 0x1a6   :  { %1179 = vmatpush1.bf16.msra.mxu0 %v2973_v4  ;;  %1222 = vmatpush1.bf16.msra.mxu1 %v2977_v5 }
 0x1a7   :  { %1326 = vmatprep.subr.bf16.mxu0 %v2878_v33  ;;  %1369 = vmatprep.subr.bf16.mxu1 %v2880_v34 }
 0x249   :  { %v1036_v21 = vpop.f32.mrf.mxu0  ;;  %v1079_v8 = vpop.f32.mrf.mxu1 }
 0x24a   :  { %v1088_v27 = vadd.f32 %v1036_v21, %v3054_v32  ;;  %v1090_v32 = vadd.f32 %v1079_v8, %v3057_v35 }
 0x24b   :  { %v1038_v52 = vpop.f32.mrf.mxu0  ;;  %v1081_v20 = vpop.f32.mrf.mxu1 }
 0x24c   :  { %v2229_v13 = vmul.f32 -1.442695, %v1088_v27  ;;  %v1089_v12 = vadd.f32 %v1038_v52, %v3060_v61  ;;  %v2231_v61 = vmul.f32 -1.442695, %v1090_v32  ;;  %v1091_v0 = vadd.f32 %v1081_v20, %v3681_v7 }
 0x24d   :  { %v1040_v15 = vpop.f32.mrf.mxu0  ;;  %v1083_v28 = vpop.f32.mrf.mxu1 }
 0x24e   :  { %2487 = vpow2.f32 %v2229_v13  ;;  %v2230_v25 = vmul.f32 -1.442695, %v1089_v12  ;;  %v1092_v31 = vadd.f32 %v1040_v15, %v3066_v9  ;;  %v1094_v18 = vadd.f32 %v1083_v28, %v3680_v30 }
 0x24f   :  { %v1042_v11 = vpop.f32.mrf.mxu0  ;;  %v1085_v43 = vpop.f32.mrf.mxu1 }
 0x250   :  { %2489 = vpow2.f32 %v2230_v25  ;;  %v2232_v26 = vmul.f32 -1.442695, %v1092_v31  ;;  %v1093_v33 = vadd.f32 %v1042_v11, %v3072_v17  ;;  %v2234_v9 = vmul.f32 -1.442695, %v1094_v18 }
 0x251   :  { %v1095_v17 = vadd.f32 %v1085_v43, %v3682_v14  ;;  %v3690_v14 = vld [vmem:[#allocation25_spill] sm:$0xff] }
 0x252   :  { %2491 = vpow2.f32 %v2232_v26  ;;  %v2233_v34 = vmul.f32 -1.442695, %v1093_v33 }
 0x254   :  { %2493 = vpow2.f32 %v2233_v34 }
 0x255   :  { %2495 = vpow2.f32 %v2231_v61 }
 0x256   :  { %2497 = vtanh.f32 %v1091_v0 }
 0x25b   :  { %v2488_v19 = vpop.eup %2487 }
 0x25c   :  { %v1114_v6 = vadd.f32 1.0, %v2488_v19 }
 0x25d   :  { %v2490_v10 = vpop.eup %2489 }
 0x25e   :  { %2499 = vrcp.f32 %v1114_v6  ;;  %v1115_v23 = vadd.f32 1.0, %v2490_v10 }
 0x25f   :  { %v2492_v29 = vpop.eup %2491  ;;  %2501 = vpow2.f32 %v2234_v9 }
 0x260   :  { %2503 = vrcp.f32 %v1115_v23  ;;  %v1117_v35 = vadd.f32 1.0, %v2492_v29 }
 0x261   :  { %v2494_v21 = vpop.eup %2493  ;;  %2505 = vtanh.f32 %v1095_v17 }
 0x262   :  { %2507 = vrcp.f32 %v1117_v35  ;;  %v1118_v27 = vadd.f32 1.0, %v2494_v21  ;;  %v2496_v52 = vpop.eup %2495 }
 0x263   :  { %v2498_v13 = vpop.eup %2497  ;;  %v1116_v26 = vadd.f32 1.0, %v2496_v52 }
 0x264   :  { %2509 = vrcp.f32 %v1118_v27 }
 0x265   :  { %2511 = vrcp.f32 %v1116_v26 }
 0x26b   :  { %v2500_v8 = vpop.eup %2499 }
 0x26c   :  { %v2502_v12 = vpop.eup %2501  ;;  %v1136_v15 = vmul.f32 %v2500_v8, %v2498_v13 }
 0x26d   :  { %v2504_v25 = vpop.eup %2503  ;;  %v1119_v28 = vadd.f32 1.0, %v2502_v12 }
 0x26e   :  { %v2506_v31 = vpop.eup %2505  ;;  %v1134_v11 = vmul.f32 %v2504_v25, %v3237_v24 }
 0x26f   :  { %v2508_v20 = vpop.eup %2507 }
 0x270   :  { %v3286_v33 = vadd.f32 %v1136_v15, %v1134_v11  ;;  %v1137_v34 = vmul.f32 %v2508_v20, %v2506_v31 }
 0x271   :  { %v2510_v32 = vpop.eup %2509 }
 0x272   :  { %v1135_v30 = vmul.f32 %v2510_v32, %v3240_v22  ;;  %2513 = vtanh.f32 %v3286_v33  ;;  %v2512_v61 = vpop.eup %2511 }
 0x273   :  { %2515 = vrcp.f32 %v1119_v28 }
 0x274   :  { %v3290_v18 = vadd.f32 %v1137_v34, %v1135_v30 }
 0x276   :  { %2517 = vtanh.f32 %v3290_v18 }
 0x27f   :  { %v2514_v7 = vpop.eup %2513 }
 0x280   :  { %v2516_v24 = vpop.eup %2515  ;;  %v1142_v43 = vmul.f32 %v2514_v7, %v2512_v61 }
 0x283   :  { %v2518_v0 = vpop.eup %2517 }
 0x284   :  { %v1143_v19 = vmul.f32 %v2518_v0, %v2516_v24 }
 0x286   :  { %v1144_v9 = vpack.c.bf16 %v1143_v19, %v1142_v43 }
 0x288   :  { %2310 = vst [vmem:[#allocation11 + $0x8] sm:$0xff] %v1144_v9   ;;  %1197 = vmatmul.mubr.bf16.vlgmr.msra.gmra.mxu0 %v1144_v9  ;;  %1240 = vmatmul.mubr.bf16.vlgmr.msra.gmra.mxu1 %v1144_v9 }
 0x289   :  { %1327 = vmatpush1.bf16.msra.mxu0 %v2882_v36  ;;  %1370 = vmatpush1.bf16.msra.mxu1 %v2888_v38  ;;  %v3325_v36 = vld [vmem:[#allocation10 + $0xe4] ss:$16 sps:$4 sm:$0xff]  }
 0x28a   :  { %1328 = vmatprep.subr.bf16.mxu0 %v2885_v37  ;;  %1371 = vmatprep.subr.bf16.mxu1 %v2890_v39  ;;  %v3328_v37 = vld [vmem:[#allocation10 + $0xec] ss:$16 sps:$4 sm:$0xff]  }
 0x28b   :  { %1358 = vmatprep.mubr.bf16.mxu0 %v3679_v16  ;;  %1401 = vmatprep.mubr.bf16.mxu1 %v3679_v16  ;;  %v3683_v39 = vld [vmem:[#allocation18_spill] sm:$0xff] }
 0x28d   :  { %1329 = vmatpush1.bf16.msra.mxu0 %v2894_v40  ;;  %1372 = vmatpush1.bf16.msra.mxu1 %v2901_v42 }
 0x28e   :  { %1330 = vmatprep.subr.bf16.mxu0 %v2898_v41  ;;  %1373 = vmatprep.subr.bf16.mxu1 %v2910_v46 }
 0x291   :  { %1331 = vmatpush1.bf16.msra.mxu0 %v2905_v44  ;;  %1374 = vmatpush1.bf16.msra.mxu1 %v2913_v47 }
 0x292   :  { %1332 = vmatprep.subr.bf16.mxu0 %v2907_v45  ;;  %1375 = vmatprep.subr.bf16.mxu1 %v2915_v48  ;;  %v3684_v45 = vld [vmem:[#allocation20_spill] sm:$0xff] }
 0x295   :  { %1333 = vmatpush1.bf16.msra.mxu0 %v2920_v49  ;;  %1376 = vmatpush1.bf16.msra.mxu1 %v2927_v51  ;;  %v3685_v49 = vld [vmem:[#allocation22_spill] sm:$0xff] }
 0x296   :  { %1334 = vmatprep.subr.bf16.mxu0 %v2922_v50  ;;  %1377 = vmatprep.subr.bf16.mxu1 %v2933_v54 }
 0x299   :  { %1335 = vmatpush1.bf16.msra.mxu0 %v2930_v53  ;;  %1378 = vmatpush1.bf16.msra.mxu1 %v2939_v56 }
 0x29a   :  { %1336 = vmatprep.subr.bf16.mxu0 %v2936_v55  ;;  %1379 = vmatprep.subr.bf16.mxu1 %v2941_v57  ;;  %v3686_v55 = vld [vmem:[#allocation24_spill] sm:$0xff] }
 0x29d   :  { %1337 = vmatpush1.bf16.msra.mxu0 %v2946_v58  ;;  %1380 = vmatpush1.bf16.msra.mxu1 %v2953_v60  ;;  %v3687_v58 = vld [vmem:[#allocation19_spill] sm:$0xff] }
 0x29e   :  { %1338 = vmatprep.subr.bf16.mxu0 %v2950_v59  ;;  %1381 = vmatprep.subr.bf16.mxu1 %v2959_v63 }
 0x2a1   :  { %1339 = vmatpush1.bf16.msra.mxu0 %v2957_v62  ;;  %1382 = vmatpush1.bf16.msra.mxu1 %v2965_v2  ;;  %v3688_v62 = vld [vmem:[#allocation23_spill] sm:$0xff]  ;;  %v3689_v2 = vld [vmem:[#allocation21_spill] sm:$0xff] }
 0x2a2   :  { %1340 = vmatprep.subr.bf16.mxu0 %v2963_v1  ;;  %1383 = vmatprep.subr.bf16.mxu1 %v2967_v3 }
 0x2a5   :  { %1341 = vmatpush1.bf16.msra.mxu0 %v2973_v4  ;;  %1384 = vmatpush1.bf16.msra.mxu1 %v2977_v5 }
 0x2a6   :  { %1488 = vmatprep.subr.bf16.mxu0 %v3325_v36  ;;  %1531 = vmatprep.subr.bf16.mxu1 %v3328_v37 }
 0x348   :  { %v1198_v38 = vpop.f32.mrf.mxu0  ;;  %v1241_v44 = vpop.f32.mrf.mxu1 }
 0x349   :  { %v1250_v40 = vadd.f32 %v1198_v38, %v3683_v39  ;;  %v1252_v59 = vadd.f32 %v1241_v44, %v3687_v58  ;;  %v3347_v39 = vld [vmem:[#allocation10 + $0xe0] ss:$16 sps:$4 sm:$0xff]   ;;  %v3364_v44 = vld [vmem:[#allocation10 + $0xc8] ss:$16 sps:$4 sm:$0xff]   ;;  %v3403_v58 = vld [vmem:[#allocation10 + $0x44] ss:$16 sps:$4 sm:$0xff]  }
 0x34a   :  { %v1200_v41 = vpop.f32.mrf.mxu0  ;;  %v1243_v53 = vpop.f32.mrf.mxu1 }
 0x34b   :  { %v2237_v42 = vmul.f32 -1.442695, %v1250_v40  ;;  %v1251_v46 = vadd.f32 %v1200_v41, %v3684_v45  ;;  %v2239_v1 = vmul.f32 -1.442695, %v1252_v59  ;;  %v1253_v3 = vadd.f32 %v1243_v53, %v3689_v2  ;;  %v3353_v40 = vld [vmem:[#allocation10 + $0xc4] ss:$16 sps:$4 sm:$0xff]  }
 0x34c   :  { %v1202_v47 = vpop.f32.mrf.mxu0  ;;  %v1245_v60 = vpop.f32.mrf.mxu1  ;;  %v3356_v41 = vld [vmem:[#allocation10 + $0xcc] ss:$16 sps:$4 sm:$0xff]   ;;  %v3367_v45 = vld [vmem:[#allocation10 + $0xa4] ss:$16 sps:$4 sm:$0xff]   ;;  %v3388_v53 = vld [vmem:[#allocation10 + $0x88] ss:$16 sps:$4 sm:$0xff]  }
 0x34d   :  { %2519 = vpow2.f32 %v2237_v42  ;;  %v2238_v48 = vmul.f32 -1.442695, %v1251_v46  ;;  %v1254_v50 = vadd.f32 %v1202_v47, %v3685_v49  ;;  %v1256_v63 = vadd.f32 %v1245_v60, %v3688_v62  ;;  %v3361_v42 = vld [vmem:[#allocation10 + $0xc0] ss:$16 sps:$4 sm:$0xff]   ;;  %v3370_v46 = vld [vmem:[#allocation10 + $0xac] ss:$16 sps:$4 sm:$0xff]  }
 0x34e   :  { %v1204_v51 = vpop.f32.mrf.mxu0  ;;  %v1247_v4 = vpop.f32.mrf.mxu1  ;;  %v3373_v47 = vld [vmem:[#allocation10 + $0xa0] ss:$16 sps:$4 sm:$0xff]   ;;  %v3379_v49 = vld [vmem:[#allocation10 + $0x84] ss:$16 sps:$4 sm:$0xff]   ;;  %v3406_v59 = vld [vmem:[#allocation10 + $0x4c] ss:$16 sps:$4 sm:$0xff]  }
 0x34f   :  { %2521 = vpow2.f32 %v2238_v48  ;;  %v2240_v54 = vmul.f32 -1.442695, %v1254_v50  ;;  %v1255_v56 = vadd.f32 %v1204_v51, %v3686_v55  ;;  %v2242_v22 = vmul.f32 -1.442695, %v1256_v63  ;;  %v3376_v48 = vld [vmem:[#allocation10 + $0xa8] ss:$16 sps:$4 sm:$0xff]  }
 0x350   :  { %v1257_v17 = vadd.f32 %v1247_v4, %v3690_v14  ;;  %v3382_v50 = vld [vmem:[#allocation10 + $0x8c] ss:$16 sps:$4 sm:$0xff]   ;;  %v3385_v51 = vld [vmem:[#allocation10 + $0x80] ss:$16 sps:$4 sm:$0xff]   ;;  %v3412_v62 = vld [vmem:[#allocation10 + $0x48] ss:$16 sps:$4 sm:$0xff]  }
 0x351   :  { %2523 = vpow2.f32 %v2240_v54  ;;  %v2241_v57 = vmul.f32 -1.442695, %v1255_v56  ;;  %v3391_v54 = vld [vmem:[#allocation10 + $0x64] ss:$16 sps:$4 sm:$0xff]   ;;  %v3394_v55 = vld [vmem:[#allocation10 + $0x6c] ss:$16 sps:$4 sm:$0xff]  }
 0x352   :  { %v3397_v56 = vld [vmem:[#allocation10 + $0x60] ss:$16 sps:$4 sm:$0xff]   ;;  %v3415_v63 = vld [vmem:[#allocation10 + $0x24] ss:$16 sps:$4 sm:$0xff]   ;;  %v3691_v14 = vld [vmem:[#allocation26_spill] sm:$0xff] }
 0x353   :  { %2525 = vpow2.f32 %v2241_v57  ;;  %v3400_v57 = vld [vmem:[#allocation10 + $0x68] ss:$16 sps:$4 sm:$0xff]   ;;  %v3409_v60 = vld [vmem:[#allocation10 + $0x40] ss:$16 sps:$4 sm:$0xff]   ;;  %v3427_v4 = vld [vmem:[#allocation10 + $0x4] ss:$16 sps:$4 sm:$0xff]  }
 0x354   :  { %2527 = vpow2.f32 %v2239_v1  ;;  %v3418_v1 = vld [vmem:[#allocation10 + $0x2c] ss:$16 sps:$4 sm:$0xff]   ;;  %v3421_v2 = vld [vmem:[#allocation10 + $0x20] ss:$16 sps:$4 sm:$0xff]  }
 0x355   :  { %2529 = vtanh.f32 %v1253_v3  ;;  %v3424_v3 = vld [vmem:[#allocation10 + $0x28] ss:$16 sps:$4 sm:$0xff]  }
 0x35a   :  { %v2520_v5 = vpop.eup %2519 }
 0x35b   :  { %v1276_v6 = vadd.f32 1.0, %v2520_v5  ;;  %v3430_v5 = vld [vmem:[#allocation10 + $0xc] ss:$16 sps:$4 sm:$0xff]  }
 0x35c   :  { %v2522_v10 = vpop.eup %2521 }
 0x35d   :  { %2531 = vrcp.f32 %v1276_v6  ;;  %v1277_v23 = vadd.f32 1.0, %v2522_v10  ;;  %v3436_v6 = vld [vmem:[#allocation10 + $0x8] ss:$16 sps:$4 sm:$0xff]  }
 0x35e   :  { %v2524_v29 = vpop.eup %2523  ;;  %2533 = vpow2.f32 %v2242_v22  ;;  %v3433_v22 = vld [vmem:[#allocation10] ss:$16 sps:$4 sm:$0xff]  }
 0x35f   :  { %2535 = vrcp.f32 %v1277_v23  ;;  %v1279_v35 = vadd.f32 1.0, %v2524_v29 }
 0x360   :  { %v2526_v21 = vpop.eup %2525  ;;  %2537 = vtanh.f32 %v1257_v17 }
 0x361   :  { %2539 = vrcp.f32 %v1279_v35  ;;  %v1280_v27 = vadd.f32 1.0, %v2526_v21  ;;  %v2528_v52 = vpop.eup %2527  ;;  %v3692_v21 = vld [vmem:[#allocation28_spill] sm:$0xff] }
 0x362   :  { %v2530_v13 = vpop.eup %2529  ;;  %v1278_v26 = vadd.f32 1.0, %v2528_v52 }
 0x363   :  { %2541 = vrcp.f32 %v1280_v27 }
 0x364   :  { %2543 = vrcp.f32 %v1278_v26 }
 0x36a   :  { %v2532_v8 = vpop.eup %2531 }
 0x36b   :  { %v2534_v12 = vpop.eup %2533  ;;  %v1298_v15 = vmul.f32 %v2532_v8, %v2530_v13  ;;  %v3693_v8 = vld [vmem:[#allocation30_spill] sm:$0xff] }
 0x36c   :  { %v2536_v25 = vpop.eup %2535  ;;  %v1281_v30 = vadd.f32 1.0, %v2534_v12 }
 0x36d   :  { %v2538_v31 = vpop.eup %2537  ;;  %v1296_v11 = vmul.f32 %v2536_v25, %v3286_v33 }
 0x36e   :  { %v2540_v20 = vpop.eup %2539 }
 0x36f   :  { %v3340_v34 = vadd.f32 %v1298_v15, %v1296_v11  ;;  %v1299_v32 = vmul.f32 %v2540_v20, %v2538_v31  ;;  %v3694_v11 = vld [vmem:[#allocation32_spill] sm:$0xff] }
 0x370   :  { %v2542_v28 = vpop.eup %2541 }
 0x371   :  { %v1297_v61 = vmul.f32 %v2542_v28, %v3290_v18  ;;  %2545 = vtanh.f32 %v3340_v34  ;;  %v2544_v24 = vpop.eup %2543  ;;  %v3350_v18 = vld [vmem:[#allocation10 + $0xe8] ss:$16 sps:$4 sm:$0xff]  }
 0x372   :  { %2547 = vrcp.f32 %v1281_v30 }
 0x373   :  { %v3344_v7 = vadd.f32 %v1299_v32, %v1297_v61  ;;  %v3695_v32 = vld [vmem:[#allocation27_spill] sm:$0xff] }
 0x374   :  { %v3696_v61 = vld [vmem:[#allocation31_spill] sm:$0xff] }
 0x375   :  { %2549 = vtanh.f32 %v3344_v7 }
 0x37e   :  { %v2546_v0 = vpop.eup %2545 }
 0x37f   :  { %v2548_v33 = vpop.eup %2547  ;;  %v1304_v19 = vmul.f32 %v2546_v0, %v2544_v24 }
 0x382   :  { %v2550_v43 = vpop.eup %2549 }
 0x383   :  { %v1305_v9 = vmul.f32 %v2550_v43, %v2548_v33  ;;  %v3697_v33 = vld [vmem:[#allocation29_spill] sm:$0xff] }
 0x385   :  { %v1306_v38 = vpack.c.bf16 %v1305_v9, %v1304_v19 }
 0x387   :  { %2315 = vst [vmem:[#allocation11 + $0x10] sm:$0xff] %v1306_v38   ;;  %1359 = vmatmul.mubr.bf16.vlgmr.msra.gmra.mxu0 %v1306_v38  ;;  %1402 = vmatmul.mubr.bf16.vlgmr.msra.gmra.mxu1 %v1306_v38 }
 0x388   :  { %1489 = vmatpush1.bf16.msra.mxu0 %v3347_v39  ;;  %1532 = vmatpush1.bf16.msra.mxu1 %v3350_v18 }
 0x389   :  { %1490 = vmatprep.subr.bf16.mxu0 %v3353_v40  ;;  %1533 = vmatprep.subr.bf16.mxu1 %v3356_v41 }
 0x38a   :  { %1520 = vmatprep.mubr.bf16.mxu0 %v3679_v16  ;;  %1563 = vmatprep.mubr.bf16.mxu1 %v3679_v16 }
 0x38c   :  { %1491 = vmatpush1.bf16.msra.mxu0 %v3361_v42  ;;  %1534 = vmatpush1.bf16.msra.mxu1 %v3364_v44 }
 0x38d   :  { %1492 = vmatprep.subr.bf16.mxu0 %v3367_v45  ;;  %1535 = vmatprep.subr.bf16.mxu1 %v3370_v46 }
 0x390   :  { %1493 = vmatpush1.bf16.msra.mxu0 %v3373_v47  ;;  %1536 = vmatpush1.bf16.msra.mxu1 %v3376_v48 }
 0x391   :  { %1494 = vmatprep.subr.bf16.mxu0 %v3379_v49  ;;  %1537 = vmatprep.subr.bf16.mxu1 %v3382_v50 }
 0x394   :  { %1495 = vmatpush1.bf16.msra.mxu0 %v3385_v51  ;;  %1538 = vmatpush1.bf16.msra.mxu1 %v3388_v53 }
 0x395   :  { %1496 = vmatprep.subr.bf16.mxu0 %v3391_v54  ;;  %1539 = vmatprep.subr.bf16.mxu1 %v3394_v55 }
 0x398   :  { %1497 = vmatpush1.bf16.msra.mxu0 %v3397_v56  ;;  %1540 = vmatpush1.bf16.msra.mxu1 %v3400_v57 }
 0x399   :  { %1498 = vmatprep.subr.bf16.mxu0 %v3403_v58  ;;  %1541 = vmatprep.subr.bf16.mxu1 %v3406_v59 }
 0x39c   :  { %1499 = vmatpush1.bf16.msra.mxu0 %v3409_v60  ;;  %1542 = vmatpush1.bf16.msra.mxu1 %v3412_v62 }
 0x39d   :  { %1500 = vmatprep.subr.bf16.mxu0 %v3415_v63  ;;  %1543 = vmatprep.subr.bf16.mxu1 %v3418_v1 }
 0x3a0   :  { %1501 = vmatpush1.bf16.msra.mxu0 %v3421_v2  ;;  %1544 = vmatpush1.bf16.msra.mxu1 %v3424_v3 }
 0x3a1   :  { %1502 = vmatprep.subr.bf16.mxu0 %v3427_v4  ;;  %1545 = vmatprep.subr.bf16.mxu1 %v3430_v5 }
 0x3a4   :  { %1503 = vmatpush1.bf16.msra.mxu0 %v3433_v22  ;;  %1546 = vmatpush1.bf16.msra.mxu1 %v3436_v6 }
 0x3a5   :  { %1650 = vmatprep.subr.bf16.mxu0 %v3325_v36  ;;  %1693 = vmatprep.subr.bf16.mxu1 %v3328_v37 }
 0x447   :  { %v1360_v10 = vpop.f32.mrf.mxu0  ;;  %v1403_v35 = vpop.f32.mrf.mxu1 }
 0x448   :  { %v1412_v17 = vadd.f32 %v1360_v10, %v3691_v14  ;;  %v1414_v28 = vadd.f32 %v1403_v35, %v3695_v32 }
 0x449   :  { %v1362_v23 = vpop.f32.mrf.mxu0  ;;  %v1405_v25 = vpop.f32.mrf.mxu1 }
 0x44a   :  { %v2245_v29 = vmul.f32 -1.442695, %v1412_v17  ;;  %v1413_v27 = vadd.f32 %v1362_v23, %v3692_v21  ;;  %v2247_v0 = vmul.f32 -1.442695, %v1414_v28  ;;  %v1415_v43 = vadd.f32 %v1405_v25, %v3697_v33  ;;  %v3698_v17 = vld [vmem:[#allocation33_spill] sm:$0xff] }
 0x44b   :  { %v1364_v52 = vpop.f32.mrf.mxu0  ;;  %v1407_v30 = vpop.f32.mrf.mxu1 }
 0x44c   :  { %2551 = vpow2.f32 %v2245_v29  ;;  %v2246_v13 = vmul.f32 -1.442695, %v1413_v27  ;;  %v1416_v12 = vadd.f32 %v1364_v52, %v3693_v8  ;;  %v1418_v24 = vadd.f32 %v1407_v30, %v3696_v61 }
 0x44d   :  { %v1366_v15 = vpop.f32.mrf.mxu0  ;;  %v1409_v19 = vpop.f32.mrf.mxu1 }
 0x44e   :  { %2553 = vpow2.f32 %v2246_v13  ;;  %v2248_v31 = vmul.f32 -1.442695, %v1416_v12  ;;  %v1417_v20 = vadd.f32 %v1366_v15, %v3694_v11  ;;  %v2250_v38 = vmul.f32 -1.442695, %v1418_v24 }
 0x44f   :  { %v1419_v23 = vadd.f32 %v1409_v19, %v3698_v17  ;;  %v3699_v17 = vld [vmem:[#allocation34_spill] sm:$0xff] }
 0x450   :  { %2555 = vpow2.f32 %v2248_v31  ;;  %v2249_v26 = vmul.f32 -1.442695, %v1417_v20 }
 0x452   :  { %2557 = vpow2.f32 %v2249_v26 }
 0x453   :  { %2559 = vpow2.f32 %v2247_v0 }
 0x454   :  { %2561 = vtanh.f32 %v1415_v43 }
 0x459   :  { %v2552_v9 = vpop.eup %2551 }
 0x45a   :  { %v1438_v10 = vadd.f32 1.0, %v2552_v9 }
 0x45b   :  { %v2554_v14 = vpop.eup %2553 }
 0x45c   :  { %2563 = vrcp.f32 %v1438_v10  ;;  %v1439_v29 = vadd.f32 1.0, %v2554_v14 }
 0x45d   :  { %v2556_v21 = vpop.eup %2555  ;;  %2565 = vpow2.f32 %v2250_v38 }
 0x45e   :  { %2567 = vrcp.f32 %v1439_v29  ;;  %v1441_v35 = vadd.f32 1.0, %v2556_v21 }
 0x45f   :  { %v2558_v27 = vpop.eup %2557  ;;  %2569 = vtanh.f32 %v1419_v23 }
 0x460   :  { %2571 = vrcp.f32 %v1441_v35  ;;  %v1442_v52 = vadd.f32 1.0, %v2558_v27  ;;  %v2560_v13 = vpop.eup %2559  ;;  %v3700_v27 = vld [vmem:[#allocation36_spill] sm:$0xff] }
 0x461   :  { %v2562_v8 = vpop.eup %2561  ;;  %v1440_v32 = vadd.f32 1.0, %v2560_v13 }
 0x462   :  { %2573 = vrcp.f32 %v1442_v52 }
 0x463   :  { %2575 = vrcp.f32 %v1440_v32 }
 0x469   :  { %v2564_v12 = vpop.eup %2563 }
 0x46a   :  { %v2566_v15 = vpop.eup %2565  ;;  %v1460_v25 = vmul.f32 %v2564_v12, %v2562_v8  ;;  %v3701_v12 = vld [vmem:[#allocation38_spill] sm:$0xff] }
 0x46b   :  { %v2568_v31 = vpop.eup %2567  ;;  %v1443_v24 = vadd.f32 1.0, %v2566_v15 }
 0x46c   :  { %v2570_v11 = vpop.eup %2569  ;;  %v1458_v20 = vmul.f32 %v2568_v31, %v3340_v34 }
 0x46d   :  { %v2572_v26 = vpop.eup %2571 }
 0x46e   :  { %v3450_v28 = vadd.f32 %v1460_v25, %v1458_v20  ;;  %v1461_v30 = vmul.f32 %v2572_v26, %v2570_v11  ;;  %v3702_v20 = vld [vmem:[#allocation40_spill] sm:$0xff] }
 0x46f   :  { %v2574_v61 = vpop.eup %2573 }
 0x470   :  { %v1459_v0 = vmul.f32 %v2574_v61, %v3344_v7  ;;  %2577 = vtanh.f32 %v3450_v28  ;;  %v2576_v43 = vpop.eup %2575 }
 0x471   :  { %2579 = vrcp.f32 %v1443_v24 }
 0x472   :  { %v3454_v33 = vadd.f32 %v1461_v30, %v1459_v0  ;;  %v3703_v30 = vld [vmem:[#allocation35_spill] sm:$0xff] }
 0x473   :  { %v3704_v0 = vld [vmem:[#allocation39_spill] sm:$0xff] }
 0x474   :  { %2581 = vtanh.f32 %v3454_v33 }
 0x47d   :  { %v2578_v19 = vpop.eup %2577 }
 0x47e   :  { %v2580_v34 = vpop.eup %2579  ;;  %v1466_v38 = vmul.f32 %v2578_v19, %v2576_v43 }
 0x481   :  { %v2582_v9 = vpop.eup %2581 }
 0x482   :  { %v1467_v10 = vmul.f32 %v2582_v9, %v2580_v34  ;;  %v3705_v34 = vld [vmem:[#allocation37_spill] sm:$0xff] }
 0x484   :  { %v1468_v14 = vpack.c.bf16 %v1467_v10, %v1466_v38 }
 0x486   :  { %2320 = vst [vmem:[#allocation11 + $0x18] sm:$0xff] %v1468_v14   ;;  %1521 = vmatmul.mubr.bf16.vlgmr.msra.gmra.mxu0 %v1468_v14  ;;  %1564 = vmatmul.mubr.bf16.vlgmr.msra.gmra.mxu1 %v1468_v14 }
 0x487   :  { %1651 = vmatpush1.bf16.msra.mxu0 %v3347_v39  ;;  %1694 = vmatpush1.bf16.msra.mxu1 %v3350_v18 }
 0x488   :  { %1652 = vmatprep.subr.bf16.mxu0 %v3353_v40  ;;  %1695 = vmatprep.subr.bf16.mxu1 %v3356_v41 }
 0x489   :  { %1682 = vmatprep.mubr.bf16.mxu0 %v3679_v16  ;;  %1725 = vmatprep.mubr.bf16.mxu1 %v3679_v16 }
 0x48b   :  { %1653 = vmatpush1.bf16.msra.mxu0 %v3361_v42  ;;  %1696 = vmatpush1.bf16.msra.mxu1 %v3364_v44 }
 0x48c   :  { %1654 = vmatprep.subr.bf16.mxu0 %v3367_v45  ;;  %1697 = vmatprep.subr.bf16.mxu1 %v3370_v46 }
 0x48f   :  { %1655 = vmatpush1.bf16.msra.mxu0 %v3373_v47  ;;  %1698 = vmatpush1.bf16.msra.mxu1 %v3376_v48 }
 0x490   :  { %1656 = vmatprep.subr.bf16.mxu0 %v3379_v49  ;;  %1699 = vmatprep.subr.bf16.mxu1 %v3382_v50 }
 0x493   :  { %1657 = vmatpush1.bf16.msra.mxu0 %v3385_v51  ;;  %1700 = vmatpush1.bf16.msra.mxu1 %v3388_v53 }
 0x494   :  { %1658 = vmatprep.subr.bf16.mxu0 %v3391_v54  ;;  %1701 = vmatprep.subr.bf16.mxu1 %v3394_v55 }
 0x497   :  { %1659 = vmatpush1.bf16.msra.mxu0 %v3397_v56  ;;  %1702 = vmatpush1.bf16.msra.mxu1 %v3400_v57 }
 0x498   :  { %1660 = vmatprep.subr.bf16.mxu0 %v3403_v58  ;;  %1703 = vmatprep.subr.bf16.mxu1 %v3406_v59 }
 0x49b   :  { %1661 = vmatpush1.bf16.msra.mxu0 %v3409_v60  ;;  %1704 = vmatpush1.bf16.msra.mxu1 %v3412_v62 }
 0x49c   :  { %1662 = vmatprep.subr.bf16.mxu0 %v3415_v63  ;;  %1705 = vmatprep.subr.bf16.mxu1 %v3418_v1 }
 0x49f   :  { %1663 = vmatpush1.bf16.msra.mxu0 %v3421_v2  ;;  %1706 = vmatpush1.bf16.msra.mxu1 %v3424_v3 }
 0x4a0   :  { %1664 = vmatprep.subr.bf16.mxu0 %v3427_v4  ;;  %1707 = vmatprep.subr.bf16.mxu1 %v3430_v5 }
 0x4a3   :  { %1665 = vmatpush1.bf16.msra.mxu0 %v3433_v22  ;;  %1708 = vmatpush1.bf16.msra.mxu1 %v3436_v6 }
 0x4a4   :  { %1812 = vmatprep.subr.bf16.mxu0 %v3325_v36  ;;  %1855 = vmatprep.subr.bf16.mxu1 %v3328_v37 }
 0x546   :  { %v1522_v7 = vpop.f32.mrf.mxu0  ;;  %v1565_v35 = vpop.f32.mrf.mxu1 }
 0x547   :  { %v1574_v23 = vadd.f32 %v1522_v7, %v3699_v17  ;;  %v1576_v61 = vadd.f32 %v1565_v35, %v3703_v30 }
 0x548   :  { %v1524_v29 = vpop.f32.mrf.mxu0  ;;  %v1567_v31 = vpop.f32.mrf.mxu1 }
 0x549   :  { %v2253_v21 = vmul.f32 -1.442695, %v1574_v23  ;;  %v1575_v52 = vadd.f32 %v1524_v29, %v3700_v27  ;;  %v2255_v19 = vmul.f32 -1.442695, %v1576_v61  ;;  %v1577_v9 = vadd.f32 %v1567_v31, %v3705_v34  ;;  %v3706_v23 = vld [vmem:[#allocation41_spill] sm:$0xff] }
 0x54a   :  { %v1526_v13 = vpop.f32.mrf.mxu0  ;;  %v1569_v24 = vpop.f32.mrf.mxu1 }
 0x54b   :  { %2583 = vpow2.f32 %v2253_v21  ;;  %v2254_v8 = vmul.f32 -1.442695, %v1575_v52  ;;  %v1578_v15 = vadd.f32 %v1526_v13, %v3701_v12  ;;  %v1580_v43 = vadd.f32 %v1569_v24, %v3704_v0 }
 0x54c   :  { %v1528_v25 = vpop.f32.mrf.mxu0  ;;  %v1571_v38 = vpop.f32.mrf.mxu1 }
 0x54d   :  { %2585 = vpow2.f32 %v2254_v8  ;;  %v2256_v11 = vmul.f32 -1.442695, %v1578_v15  ;;  %v1579_v26 = vadd.f32 %v1528_v25, %v3702_v20  ;;  %v2258_v14 = vmul.f32 -1.442695, %v1580_v43 }
 0x54e   :  { %v1581_v29 = vadd.f32 %v1571_v38, %v3706_v23  ;;  %v3707_v23 = vld [vmem:[#allocation42_spill] sm:$0xff] }
 0x54f   :  { %2587 = vpow2.f32 %v2256_v11  ;;  %v2257_v32 = vmul.f32 -1.442695, %v1579_v26 }
 0x551   :  { %2589 = vpow2.f32 %v2257_v32 }
 0x552   :  { %2591 = vpow2.f32 %v2255_v19 }
 0x553   :  { %2593 = vtanh.f32 %v1577_v9 }
 0x558   :  { %v2584_v10 = vpop.eup %2583 }
 0x559   :  { %v1600_v7 = vadd.f32 1.0, %v2584_v10 }
 0x55a   :  { %v2586_v17 = vpop.eup %2585 }
 0x55b   :  { %2595 = vrcp.f32 %v1600_v7  ;;  %v1601_v21 = vadd.f32 1.0, %v2586_v17 }
 0x55c   :  { %v2588_v27 = vpop.eup %2587  ;;  %2597 = vpow2.f32 %v2258_v14 }
 0x55d   :  { %2599 = vrcp.f32 %v1601_v21  ;;  %v1603_v35 = vadd.f32 1.0, %v2588_v27 }
 0x55e   :  { %v2590_v52 = vpop.eup %2589  ;;  %2601 = vtanh.f32 %v1581_v29 }
 0x55f   :  { %2603 = vrcp.f32 %v1603_v35  ;;  %v1604_v13 = vadd.f32 1.0, %v2590_v52  ;;  %v2592_v8 = vpop.eup %2591  ;;  %v3708_v52 = vld [vmem:[#allocation44_spill] sm:$0xff] }
 0x560   :  { %v2594_v12 = vpop.eup %2593  ;;  %v1602_v30 = vadd.f32 1.0, %v2592_v8 }
 0x561   :  { %2605 = vrcp.f32 %v1604_v13 }
 0x562   :  { %2607 = vrcp.f32 %v1602_v30 }
 0x568   :  { %v2596_v15 = vpop.eup %2595 }
 0x569   :  { %v2598_v25 = vpop.eup %2597  ;;  %v1622_v31 = vmul.f32 %v2596_v15, %v2594_v12  ;;  %v3709_v15 = vld [vmem:[#allocation46_spill] sm:$0xff] }
 0x56a   :  { %v2600_v11 = vpop.eup %2599  ;;  %v1605_v43 = vadd.f32 1.0, %v2598_v25 }
 0x56b   :  { %v2602_v20 = vpop.eup %2601  ;;  %v1620_v26 = vmul.f32 %v2600_v11, %v3450_v28 }
 0x56c   :  { %v2604_v32 = vpop.eup %2603 }
 0x56d   :  { %v3500_v61 = vadd.f32 %v1622_v31, %v1620_v26  ;;  %v1623_v24 = vmul.f32 %v2604_v32, %v2602_v20  ;;  %v3711_v32 = vld [vmem:[#allocation43_spill] sm:$0xff] }
 0x56e   :  { %v2606_v0 = vpop.eup %2605 }
 0x56f   :  { %v1621_v19 = vmul.f32 %v2606_v0, %v3454_v33  ;;  %2609 = vtanh.f32 %v3500_v61  ;;  %v2608_v9 = vpop.eup %2607  ;;  %v3712_v0 = vld [vmem:[#allocation47_spill] sm:$0xff] }
 0x570   :  { %2611 = vrcp.f32 %v1605_v43 }
 0x571   :  { %v3504_v34 = vadd.f32 %v1623_v24, %v1621_v19 }
 0x573   :  { %2613 = vtanh.f32 %v3504_v34 }
 0x57c   :  { %v2610_v38 = vpop.eup %2609 }
 0x57d   :  { %v2612_v28 = vpop.eup %2611  ;;  %v1628_v14 = vmul.f32 %v2610_v38, %v2608_v9  ;;  %v3713_v9 = vld [vmem:[#allocation45_spill] sm:$0xff] }
 0x580   :  { %v2614_v10 = vpop.eup %2613 }
 0x581   :  { %v1629_v7 = vmul.f32 %v2614_v10, %v2612_v28 }
 0x583   :  { %v1630_v17 = vpack.c.bf16 %v1629_v7, %v1628_v14 }
 0x585   :  { %2325 = vst [vmem:[#allocation11 + $0x20] sm:$0xff] %v1630_v17   ;;  %1683 = vmatmul.mubr.bf16.vlgmr.msra.gmra.mxu0 %v1630_v17  ;;  %1726 = vmatmul.mubr.bf16.vlgmr.msra.gmra.mxu1 %v1630_v17 }
 0x586   :  { %1813 = vmatpush1.bf16.msra.mxu0 %v3347_v39  ;;  %1856 = vmatpush1.bf16.msra.mxu1 %v3350_v18 }
 0x587   :  { %1814 = vmatprep.subr.bf16.mxu0 %v3353_v40  ;;  %1857 = vmatprep.subr.bf16.mxu1 %v3356_v41 }
 0x588   :  { %1844 = vmatprep.mubr.bf16.mxu0 %v3679_v16  ;;  %1887 = vmatprep.mubr.bf16.mxu1 %v3679_v16 }
 0x58a   :  { %1815 = vmatpush1.bf16.msra.mxu0 %v3361_v42  ;;  %1858 = vmatpush1.bf16.msra.mxu1 %v3364_v44 }
 0x58b   :  { %1816 = vmatprep.subr.bf16.mxu0 %v3367_v45  ;;  %1859 = vmatprep.subr.bf16.mxu1 %v3370_v46 }
 0x58e   :  { %1817 = vmatpush1.bf16.msra.mxu0 %v3373_v47  ;;  %1860 = vmatpush1.bf16.msra.mxu1 %v3376_v48 }
 0x58f   :  { %1818 = vmatprep.subr.bf16.mxu0 %v3379_v49  ;;  %1861 = vmatprep.subr.bf16.mxu1 %v3382_v50 }
 0x592   :  { %1819 = vmatpush1.bf16.msra.mxu0 %v3385_v51  ;;  %1862 = vmatpush1.bf16.msra.mxu1 %v3388_v53 }
 0x593   :  { %1820 = vmatprep.subr.bf16.mxu0 %v3391_v54  ;;  %1863 = vmatprep.subr.bf16.mxu1 %v3394_v55 }
 0x596   :  { %1821 = vmatpush1.bf16.msra.mxu0 %v3397_v56  ;;  %1864 = vmatpush1.bf16.msra.mxu1 %v3400_v57 }
 0x597   :  { %1822 = vmatprep.subr.bf16.mxu0 %v3403_v58  ;;  %1865 = vmatprep.subr.bf16.mxu1 %v3406_v59 }
 0x59a   :  { %1823 = vmatpush1.bf16.msra.mxu0 %v3409_v60  ;;  %1866 = vmatpush1.bf16.msra.mxu1 %v3412_v62 }
 0x59b   :  { %1824 = vmatprep.subr.bf16.mxu0 %v3415_v63  ;;  %1867 = vmatprep.subr.bf16.mxu1 %v3418_v1 }
 0x59e   :  { %1825 = vmatpush1.bf16.msra.mxu0 %v3421_v2  ;;  %1868 = vmatpush1.bf16.msra.mxu1 %v3424_v3 }
 0x59f   :  { %1826 = vmatprep.subr.bf16.mxu0 %v3427_v4  ;;  %1869 = vmatprep.subr.bf16.mxu1 %v3430_v5 }
 0x5a2   :  { %1827 = vmatpush1.bf16.msra.mxu0 %v3433_v22  ;;  %1870 = vmatpush1.bf16.msra.mxu1 %v3436_v6 }
 0x5a3   :  { %1974 = vmatprep.subr.bf16.mxu0 %v3325_v36  ;;  %2017 = vmatprep.subr.bf16.mxu1 %v3328_v37  ;;  %v3710_v36 = vld [vmem:[#allocation48_spill] sm:$0xff] }
 0x645   :  { %v1684_v33 = vpop.f32.mrf.mxu0  ;;  %v1727_v35 = vpop.f32.mrf.mxu1 }
 0x646   :  { %v1736_v29 = vadd.f32 %v1684_v33, %v3707_v23  ;;  %v1738_v30 = vadd.f32 %v1727_v35, %v3711_v32  ;;  %v3714_v33 = vld [vmem:[#allocation49_spill] sm:$0xff] }
 0x647   :  { %v1686_v21 = vpop.f32.mrf.mxu0  ;;  %v1729_v11 = vpop.f32.mrf.mxu1 }
 0x648   :  { %v2261_v27 = vmul.f32 -1.442695, %v1736_v29  ;;  %v1737_v13 = vadd.f32 %v1686_v21, %v3708_v52  ;;  %v2263_v19 = vmul.f32 -1.442695, %v1738_v30  ;;  %v1739_v38 = vadd.f32 %v1729_v11, %v3713_v9 }
 0x649   :  { %v1688_v8 = vpop.f32.mrf.mxu0  ;;  %v1731_v24 = vpop.f32.mrf.mxu1 }
 0x64a   :  { %2615 = vpow2.f32 %v2261_v27  ;;  %v2262_v12 = vmul.f32 -1.442695, %v1737_v13  ;;  %v1740_v25 = vadd.f32 %v1688_v8, %v3709_v15  ;;  %v1742_v43 = vadd.f32 %v1731_v24, %v3712_v0 }
 0x64b   :  { %v1690_v31 = vpop.f32.mrf.mxu0  ;;  %v1733_v28 = vpop.f32.mrf.mxu1 }
 0x64c   :  { %2617 = vpow2.f32 %v2262_v12  ;;  %v2264_v20 = vmul.f32 -1.442695, %v1740_v25  ;;  %v1741_v26 = vadd.f32 %v1690_v31, %v3710_v36  ;;  %v2266_v14 = vmul.f32 -1.442695, %v1742_v43 }
 0x64d   :  { %v1743_v23 = vadd.f32 %v1733_v28, %v3714_v33 }
 0x64e   :  { %2619 = vpow2.f32 %v2264_v20  ;;  %v2265_v37 = vmul.f32 -1.442695, %v1741_v26 }
 0x650   :  { %2621 = vpow2.f32 %v2265_v37 }
 0x651   :  { %2623 = vpow2.f32 %v2263_v19 }
 0x652   :  { %2625 = vtanh.f32 %v1739_v38 }
 0x657   :  { %v2616_v10 = vpop.eup %2615 }
 0x658   :  { %v1762_v7 = vadd.f32 1.0, %v2616_v10 }
 0x659   :  { %v2618_v17 = vpop.eup %2617 }
 0x65a   :  { %2627 = vrcp.f32 %v1762_v7  ;;  %v1763_v29 = vadd.f32 1.0, %v2618_v17 }
 0x65b   :  { %v2620_v21 = vpop.eup %2619  ;;  %2629 = vpow2.f32 %v2266_v14 }
 0x65c   :  { %2631 = vrcp.f32 %v1763_v29  ;;  %v1765_v27 = vadd.f32 1.0, %v2620_v21 }
 0x65d   :  { %v2622_v35 = vpop.eup %2621  ;;  %2633 = vtanh.f32 %v1743_v23 }
 0x65e   :  { %2635 = vrcp.f32 %v1765_v27  ;;  %v1766_v52 = vadd.f32 1.0, %v2622_v35  ;;  %v2624_v13 = vpop.eup %2623 }
 0x65f   :  { %v2626_v8 = vpop.eup %2625  ;;  %v1764_v26 = vadd.f32 1.0, %v2624_v13 }
 0x660   :  { %2637 = vrcp.f32 %v1766_v52 }
 0x661   :  { %2639 = vrcp.f32 %v1764_v26 }
 0x667   :  { %v2628_v12 = vpop.eup %2627 }
 0x668   :  { %v2630_v15 = vpop.eup %2629  ;;  %v1784_v25 = vmul.f32 %v2628_v12, %v2626_v8 }
 0x669   :  { %v2632_v31 = vpop.eup %2631  ;;  %v1767_v24 = vadd.f32 1.0, %v2630_v15 }
 0x66a   :  { %v2634_v11 = vpop.eup %2633  ;;  %v1782_v20 = vmul.f32 %v2632_v31, %v3500_v61 }
 0x66b   :  { %v2636_v36 = vpop.eup %2635 }
 0x66c   :  { %v3550_v37 = vadd.f32 %v1784_v25, %v1782_v20  ;;  %v1785_v32 = vmul.f32 %v2636_v36, %v2634_v11 }
 0x66d   :  { %v2638_v30 = vpop.eup %2637 }
 0x66e   :  { %v1783_v0 = vmul.f32 %v2638_v30, %v3504_v34  ;;  %2641 = vtanh.f32 %v3550_v37  ;;  %v2640_v19 = vpop.eup %2639  ;;  %v3722_v34 = vld [vmem:[#allocation57_spill] sm:$0xff] }
 0x66f   :  { %2643 = vrcp.f32 %v1767_v24 }
 0x670   :  { %v3554_v43 = vadd.f32 %v1785_v32, %v1783_v0 }
 0x672   :  { %2645 = vtanh.f32 %v3554_v43 }
 0x67b   :  { %v2642_v9 = vpop.eup %2641 }
 0x67c   :  { %v2644_v61 = vpop.eup %2643  ;;  %v1790_v28 = vmul.f32 %v2642_v9, %v2640_v19 }
 0x67f   :  { %v2646_v38 = vpop.eup %2645 }
 0x680   :  { %v1791_v10 = vmul.f32 %v2646_v38, %v2644_v61 }
 0x682   :  { %v1792_v14 = vpack.c.bf16 %v1791_v10, %v1790_v28 }
 0x684   :  { %2330 = vst [vmem:[#allocation11 + $0x28] sm:$0xff] %v1792_v14   ;;  %1845 = vmatmul.mubr.bf16.vlgmr.msra.gmra.mxu0 %v1792_v14  ;;  %1888 = vmatmul.mubr.bf16.vlgmr.msra.gmra.mxu1 %v1792_v14 }
 0x685   :  { %1975 = vmatpush1.bf16.msra.mxu0 %v3347_v39  ;;  %2018 = vmatpush1.bf16.msra.mxu1 %v3350_v18  ;;  %v3715_v39 = vld [vmem:[#allocation50_spill] sm:$0xff] }
 0x686   :  { %1976 = vmatprep.subr.bf16.mxu0 %v3353_v40  ;;  %2019 = vmatprep.subr.bf16.mxu1 %v3356_v41 }
 0x687   :  { %2006 = vmatprep.mubr.bf16.mxu0 %v3679_v16  ;;  %2049 = vmatprep.mubr.bf16.mxu1 %v3679_v16 }
 0x689   :  { %1977 = vmatpush1.bf16.msra.mxu0 %v3361_v42  ;;  %2020 = vmatpush1.bf16.msra.mxu1 %v3364_v44  ;;  %v3716_v44 = vld [vmem:[#allocation52_spill] sm:$0xff] }
 0x68a   :  { %1978 = vmatprep.subr.bf16.mxu0 %v3367_v45  ;;  %2021 = vmatprep.subr.bf16.mxu1 %v3370_v46 }
 0x68d   :  { %1979 = vmatpush1.bf16.msra.mxu0 %v3373_v47  ;;  %2022 = vmatpush1.bf16.msra.mxu1 %v3376_v48  ;;  %v3717_v48 = vld [vmem:[#allocation54_spill] sm:$0xff] }
 0x68e   :  { %1980 = vmatprep.subr.bf16.mxu0 %v3379_v49  ;;  %2023 = vmatprep.subr.bf16.mxu1 %v3382_v50 }
 0x691   :  { %1981 = vmatpush1.bf16.msra.mxu0 %v3385_v51  ;;  %2024 = vmatpush1.bf16.msra.mxu1 %v3388_v53 }
 0x692   :  { %1982 = vmatprep.subr.bf16.mxu0 %v3391_v54  ;;  %2025 = vmatprep.subr.bf16.mxu1 %v3394_v55  ;;  %v3718_v54 = vld [vmem:[#allocation56_spill] sm:$0xff] }
 0x695   :  { %1983 = vmatpush1.bf16.msra.mxu0 %v3397_v56  ;;  %2026 = vmatpush1.bf16.msra.mxu1 %v3400_v57  ;;  %v3719_v57 = vld [vmem:[#allocation51_spill] sm:$0xff] }
 0x696   :  { %1984 = vmatprep.subr.bf16.mxu0 %v3403_v58  ;;  %2027 = vmatprep.subr.bf16.mxu1 %v3406_v59 }
 0x699   :  { %1985 = vmatpush1.bf16.msra.mxu0 %v3409_v60  ;;  %2028 = vmatpush1.bf16.msra.mxu1 %v3412_v62  ;;  %v3720_v60 = vld [vmem:[#allocation55_spill] sm:$0xff] }
 0x69a   :  { %1986 = vmatprep.subr.bf16.mxu0 %v3415_v63  ;;  %2029 = vmatprep.subr.bf16.mxu1 %v3418_v1  ;;  %v3721_v1 = vld [vmem:[#allocation53_spill] sm:$0xff] }
 0x69d   :  { %1987 = vmatpush1.bf16.msra.mxu0 %v3421_v2  ;;  %2030 = vmatpush1.bf16.msra.mxu1 %v3424_v3 }
 0x69e   :  { %1988 = vmatprep.subr.bf16.mxu0 %v3427_v4  ;;  %2031 = vmatprep.subr.bf16.mxu1 %v3430_v5 }
 0x6a1   :  { %1989 = vmatpush1.bf16.msra.mxu0 %v3433_v22  ;;  %2032 = vmatpush1.bf16.msra.mxu1 %v3436_v6 }
 0x744   :  { %v1846_v16 = vpop.f32.mrf.mxu0  ;;  %v1889_v42 = vpop.f32.mrf.mxu1 }
 0x745   :  { %v1898_v18 = vadd.f32 %v1846_v16, %v3715_v39  ;;  %v1900_v58 = vadd.f32 %v1889_v42, %v3719_v57  ;;  %v3728_v57 = vld [vmem:[#allocation63_spill] sm:$0xff] }
 0x746   :  { %v1848_v40 = vpop.f32.mrf.mxu0  ;;  %v1891_v51 = vpop.f32.mrf.mxu1 }
 0x747   :  { %v2269_v41 = vmul.f32 -1.442695, %v1898_v18  ;;  %v1899_v45 = vadd.f32 %v1848_v40, %v3716_v44  ;;  %v2271_v63 = vmul.f32 -1.442695, %v1900_v58  ;;  %v1901_v2 = vadd.f32 %v1891_v51, %v3721_v1  ;;  %v3724_v40 = vld [vmem:[#allocation60_spill] sm:$0xff] }
 0x748   :  { %v1850_v46 = vpop.f32.mrf.mxu0  ;;  %v1893_v59 = vpop.f32.mrf.mxu1 }
 0x749   :  { %2647 = vpow2.f32 %v2269_v41  ;;  %v2270_v47 = vmul.f32 -1.442695, %v1899_v45  ;;  %v1902_v49 = vadd.f32 %v1850_v46, %v3717_v48  ;;  %v1904_v62 = vadd.f32 %v1893_v59, %v3720_v60  ;;  %v3725_v45 = vld [vmem:[#allocation62_spill] sm:$0xff]  ;;  %v3729_v60 = vld [vmem:[#allocation61_spill] sm:$0xff] }
 0x74a   :  { %v1852_v50 = vpop.f32.mrf.mxu0  ;;  %v1895_v3 = vpop.f32.mrf.mxu1 }
 0x74b   :  { %2649 = vpow2.f32 %v2270_v47  ;;  %v2272_v53 = vmul.f32 -1.442695, %v1902_v49  ;;  %v1903_v55 = vadd.f32 %v1852_v50, %v3718_v54  ;;  %v2274_v5 = vmul.f32 -1.442695, %v1904_v62  ;;  %v3726_v50 = vld [vmem:[#allocation64_spill] sm:$0xff]  ;;  %v3727_v54 = vld [vmem:[#allocation59_spill] sm:$0xff] }
 0x74c   :  { %v1905_v7 = vadd.f32 %v1895_v3, %v3722_v34 }
 0x74d   :  { %2651 = vpow2.f32 %v2272_v53  ;;  %v2273_v56 = vmul.f32 -1.442695, %v1903_v55 }
 0x74f   :  { %2653 = vpow2.f32 %v2273_v56 }
 0x750   :  { %2655 = vpow2.f32 %v2271_v63 }
 0x751   :  { %2657 = vtanh.f32 %v1901_v2 }
 0x756   :  { %v2648_v4 = vpop.eup %2647 }
 0x757   :  { %v1924_v22 = vadd.f32 1.0, %v2648_v4 }
 0x758   :  { %v2650_v6 = vpop.eup %2649 }
 0x759   :  { %2659 = vrcp.f32 %v1924_v22  ;;  %v1925_v17 = vadd.f32 1.0, %v2650_v6 }
 0x75a   :  { %v2652_v33 = vpop.eup %2651  ;;  %2661 = vpow2.f32 %v2274_v5  ;;  %v3730_v5 = vld [vmem:[#allocation65_spill] sm:$0xff] }
 0x75b   :  { %2663 = vrcp.f32 %v1925_v17  ;;  %v1927_v23 = vadd.f32 1.0, %v2652_v33 }
 0x75c   :  { %v2654_v29 = vpop.eup %2653  ;;  %2665 = vtanh.f32 %v1905_v7 }
 0x75d   :  { %2667 = vrcp.f32 %v1927_v23  ;;  %v1928_v21 = vadd.f32 1.0, %v2654_v29  ;;  %v2656_v27 = vpop.eup %2655 }
 0x75e   :  { %v2658_v35 = vpop.eup %2657  ;;  %v1926_v11 = vadd.f32 1.0, %v2656_v27 }
 0x75f   :  { %2669 = vrcp.f32 %v1928_v21 }
 0x760   :  { %2671 = vrcp.f32 %v1926_v11 }
 0x766   :  { %v2660_v52 = vpop.eup %2659 }
 0x767   :  { %v2662_v13 = vpop.eup %2661  ;;  %v1946_v8 = vmul.f32 %v2660_v52, %v2658_v35 }
 0x768   :  { %v2664_v12 = vpop.eup %2663  ;;  %v1929_v32 = vadd.f32 1.0, %v2662_v13 }
 0x769   :  { %v2666_v15 = vpop.eup %2665  ;;  %v1944_v25 = vmul.f32 %v2664_v12, %v3550_v37 }
 0x76a   :  { %v2668_v31 = vpop.eup %2667 }
 0x76b   :  { %v3598_v20 = vadd.f32 %v1946_v8, %v1944_v25  ;;  %v1947_v36 = vmul.f32 %v2668_v31, %v2666_v15 }
 0x76c   :  { %v2670_v26 = vpop.eup %2669 }
 0x76d   :  { %v1945_v30 = vmul.f32 %v2670_v26, %v3554_v43  ;;  %2673 = vtanh.f32 %v3598_v20  ;;  %v2672_v0 = vpop.eup %2671  ;;  %v3723_v43 = vld [vmem:[#allocation58_spill] sm:$0xff] }
 0x76e   :  { %2675 = vrcp.f32 %v1929_v32 }
 0x76f   :  { %v3602_v24 = vadd.f32 %v1947_v36, %v1945_v30 }
 0x771   :  { %2677 = vtanh.f32 %v3602_v24 }
 0x77a   :  { %v2674_v19 = vpop.eup %2673 }
 0x77b   :  { %v2676_v37 = vpop.eup %2675  ;;  %v1952_v61 = vmul.f32 %v2674_v19, %v2672_v0 }
 0x77e   :  { %v2678_v9 = vpop.eup %2677 }
 0x77f   :  { %v1953_v38 = vmul.f32 %v2678_v9, %v2676_v37 }
 0x781   :  { %v1954_v28 = vpack.c.bf16 %v1953_v38, %v1952_v61 }
 0x783   :  { %2335 = vst [vmem:[#allocation11 + $0x30] sm:$0xff] %v1954_v28   ;;  %2007 = vmatmul.mubr.bf16.vlgmr.msra.gmra.mxu0 %v1954_v28  ;;  %2050 = vmatmul.mubr.bf16.vlgmr.msra.gmra.mxu1 %v1954_v28 }
 0x843   :  { %v2008_v10 = vpop.f32.mrf.mxu0  ;;  %v2051_v18 = vpop.f32.mrf.mxu1 }
 0x844   :  { %v2060_v14 = vadd.f32 %v2008_v10, %v3723_v43  ;;  %v2062_v55 = vadd.f32 %v2051_v18, %v3727_v54 }
 0x845   :  { %v2010_v16 = vpop.f32.mrf.mxu0  ;;  %v2053_v48 = vpop.f32.mrf.mxu1 }
 0x846   :  { %v2277_v39 = vmul.f32 -1.442695, %v2060_v14  ;;  %v2061_v41 = vadd.f32 %v2010_v16, %v3724_v40  ;;  %v2279_v59 = vmul.f32 -1.442695, %v2062_v55  ;;  %v2063_v62 = vadd.f32 %v2053_v48, %v3729_v60 }
 0x847   :  { %v2012_v42 = vpop.f32.mrf.mxu0  ;;  %v2055_v56 = vpop.f32.mrf.mxu1 }
 0x848   :  { %2679 = vpow2.f32 %v2277_v39  ;;  %v2278_v44 = vmul.f32 -1.442695, %v2061_v41  ;;  %v2064_v46 = vadd.f32 %v2012_v42, %v3725_v45  ;;  %v2066_v58 = vadd.f32 %v2055_v56, %v3728_v57 }
 0x849   :  { %v2014_v47 = vpop.f32.mrf.mxu0  ;;  %v2057_v63 = vpop.f32.mrf.mxu1 }
 0x84a   :  { %2681 = vpow2.f32 %v2278_v44  ;;  %v2280_v49 = vmul.f32 -1.442695, %v2064_v46  ;;  %v2065_v51 = vadd.f32 %v2014_v47, %v3726_v50  ;;  %v2282_v2 = vmul.f32 -1.442695, %v2066_v58 }
 0x84b   :  { %v2067_v22 = vadd.f32 %v2057_v63, %v3730_v5 }
 0x84c   :  { %2683 = vpow2.f32 %v2280_v49  ;;  %v2281_v53 = vmul.f32 -1.442695, %v2065_v51 }
 0x84e   :  { %2685 = vpow2.f32 %v2281_v53 }
 0x84f   :  { %2687 = vpow2.f32 %v2279_v59 }
 0x850   :  { %2689 = vtanh.f32 %v2063_v62 }
 0x855   :  { %v2680_v1 = vpop.eup %2679 }
 0x856   :  { %v2086_v3 = vadd.f32 1.0, %v2680_v1 }
 0x857   :  { %v2682_v4 = vpop.eup %2681 }
 0x858   :  { %2691 = vrcp.f32 %v2086_v3  ;;  %v2087_v6 = vadd.f32 1.0, %v2682_v4 }
 0x859   :  { %v2684_v34 = vpop.eup %2683  ;;  %2693 = vpow2.f32 %v2282_v2 }
 0x85a   :  { %2695 = vrcp.f32 %v2087_v6  ;;  %v2089_v7 = vadd.f32 1.0, %v2684_v34 }
 0x85b   :  { %v2686_v17 = vpop.eup %2685  ;;  %2697 = vtanh.f32 %v2067_v22 }
 0x85c   :  { %2699 = vrcp.f32 %v2089_v7  ;;  %v2090_v33 = vadd.f32 1.0, %v2686_v17  ;;  %v2688_v23 = vpop.eup %2687 }
 0x85d   :  { %v2690_v29 = vpop.eup %2689  ;;  %v2088_v13 = vadd.f32 1.0, %v2688_v23 }
 0x85e   :  { %2701 = vrcp.f32 %v2090_v33 }
 0x85f   :  { %2703 = vrcp.f32 %v2088_v13 }
 0x865   :  { %v2692_v21 = vpop.eup %2691 }
 0x866   :  { %v2694_v27 = vpop.eup %2693  ;;  %v2108_v35 = vmul.f32 %v2692_v21, %v2690_v29 }
 0x867   :  { %v2696_v52 = vpop.eup %2695  ;;  %v2091_v36 = vadd.f32 1.0, %v2694_v27 }
 0x868   :  { %v2698_v8 = vpop.eup %2697  ;;  %v2106_v12 = vmul.f32 %v2696_v52, %v3598_v20 }
 0x869   :  { %v2700_v15 = vpop.eup %2699 }
 0x86a   :  { %v2110_v25 = vadd.f32 %v2108_v35, %v2106_v12  ;;  %v2109_v31 = vmul.f32 %v2700_v15, %v2698_v8 }
 0x86b   :  { %v2702_v11 = vpop.eup %2701 }
 0x86c   :  { %2705 = vtanh.f32 %v2110_v25  ;;  %v2107_v26 = vmul.f32 %v2702_v11, %v3602_v24  ;;  %v2704_v30 = vpop.eup %2703 }
 0x86d   :  { %2707 = vrcp.f32 %v2091_v36 }
 0x86e   :  { %v2111_v32 = vadd.f32 %v2109_v31, %v2107_v26 }
 0x870   :  { %2709 = vtanh.f32 %v2111_v32 }
 0x879   :  { %v2706_v0 = vpop.eup %2705 }
 0x87a   :  { %v2114_v19 = vmul.f32 %v2706_v0, %v2704_v30  ;;  %v2708_v37 = vpop.eup %2707 }
 0x87d   :  { %v2710_v9 = vpop.eup %2709 }
 0x87e   :  { %v2115_v20 = vmul.f32 %v2710_v9, %v2708_v37 }
 0x880   :  { %v2339_v61 = vpack.c.bf16 %v2115_v20, %v2114_v19 }
 0x882   :  { %2340 = vst [vmem:[#allocation11 + $0x38] sm:$0xff] %v2339_v61  }
 0x883   :  { %2814 = shalt.err (!%p2811_p5)
}
 0x884   :  { %2142 = dma.vmem_to_hbm [thread:$0]  %s2137_s7, 1024, %s3625_s4, [#allocation7], %s2833_s25, %s2833_s25, %s2834_s26  }
 0x885   :  { %2827 = dma.done.wait [#allocation7], 1024  }
 0x886   :  { %2828 = vsyncadd [#allocation7], 4294966272 }
 0x887   :  { %2146 = vsyncpa [#allocation6], 1 }
 0x888   :  { %2147 = vsyncpa [#allocation9], 1 }
 0x889   :  { %2148 = vsyncpa [#allocation7], 1 }

</bundles_post_ra>
